<compile_context>
chip_gen: v7x
topology: tpu7x:2x2x1
jax: 0.10.0
libtpu: 0.0.40
codegen_flags: <defaults>
</compile_context>

<pallas_src>
import functools
import math

import jax
import jax.numpy as jnp
from jax.experimental import pallas as pl
from jax.experimental.pallas import tpu as pltpu

ACT_NONE, ACT_LRELU, ACT_RELU = 0, 1, 2
BN_EPS = 1e-5


def _round_up(x, m):
    return ((x + m - 1) // m) * m


# ----------------------------------------------------------------------------
# Pallas kernel 1: tiled bf16 matmul with fused scale/shift + activation
# (optionally also emitting per-column sum / sum-of-squares for BatchNorm).
# ----------------------------------------------------------------------------
def _apply_act(y, act):
    if act == ACT_LRELU:
        return jnp.where(y >= 0, y, 0.2 * y)
    if act == ACT_RELU:
        return jnp.maximum(y, 0.0)
    return y


def _mm_kernel(a_ref, b_ref, s_ref, t_ref, o_ref, acc_ref, *, act):
    """Grid (m, n, k):  o = act((A @ B) * s + t)."""
    k = pl.program_id(2)

    @pl.when(k == 0)
    def _():
        acc_ref[...] = jnp.zeros_like(acc_ref)

    acc_ref[...] += jnp.dot(a_ref[...], b_ref[...],
                            preferred_element_type=jnp.float32)

    @pl.when(k == pl.num_programs(2) - 1)
    def _():
        y = acc_ref[...] * s_ref[...] + t_ref[...]
        o_ref[...] = _apply_act(y, act).astype(o_ref.dtype)


def _mm_stats_kernel(a_ref, b_ref, s_ref, t_ref, o_ref, sum_ref, sq_ref,
                     acc_ref, *, act):
    """Grid (n, m, k): like _mm_kernel, plus per-column sum / sumsq of A @ B.

    sum/sq output blocks depend only on n, so they stay VMEM-resident across the
    (consecutive) m and k axes and act as f32 accumulators (no extra HBM pass).
    """
    m = pl.program_id(1)
    k = pl.program_id(2)

    @pl.when(k == 0)
    def _():
        acc_ref[...] = jnp.zeros_like(acc_ref)

    @pl.when(jnp.logical_and(m == 0, k == 0))
    def _():
        sum_ref[...] = jnp.zeros_like(sum_ref)
        sq_ref[...] = jnp.zeros_like(sq_ref)

    acc_ref[...] += jnp.dot(a_ref[...], b_ref[...],
                            preferred_element_type=jnp.float32)

    @pl.when(k == pl.num_programs(2) - 1)
    def _():
        acc = acc_ref[...]
        sum_ref[...] += jnp.sum(acc, axis=0, keepdims=True)
        sq_ref[...] += jnp.sum(acc * acc, axis=0, keepdims=True)
        y = acc * s_ref[...] + t_ref[...]
        o_ref[...] = _apply_act(y, act).astype(o_ref.dtype)


@functools.lru_cache(maxsize=None)
def _mm_call(Mp, Kp, Np, TM, TK, TN, act, out_dtype_name, with_stats):
    out_dtype = jnp.dtype(out_dtype_name)
    nm, nn, nk = Mp // TM, Np // TN, Kp // TK
    if with_stats:
        grid = (nn, nm, nk)
        in_specs = [
            pl.BlockSpec((TM, TK), lambda n, m, k: (m, k)),
            pl.BlockSpec((TK, TN), lambda n, m, k: (k, n)),
            pl.BlockSpec((1, TN), lambda n, m, k: (0, n)),
            pl.BlockSpec((1, TN), lambda n, m, k: (0, n)),
        ]
        out_specs = [
            pl.BlockSpec((TM, TN), lambda n, m, k: (m, n)),
            pl.BlockSpec((1, TN), lambda n, m, k: (0, n)),
            pl.BlockSpec((1, TN), lambda n, m, k: (0, n)),
        ]
        out_shape = [
            jax.ShapeDtypeStruct((Mp, Np), out_dtype),
            jax.ShapeDtypeStruct((1, Np), jnp.float32),
            jax.ShapeDtypeStruct((1, Np), jnp.float32),
        ]
        kernel = functools.partial(_mm_stats_kernel, act=act)
        dims = ("parallel", "arbitrary", "arbitrary")
    else:
        grid = (nm, nn, nk)
        in_specs = [
            pl.BlockSpec((TM, TK), lambda m, n, k: (m, k)),
            pl.BlockSpec((TK, TN), lambda m, n, k: (k, n)),
            pl.BlockSpec((1, TN), lambda m, n, k: (0, n)),
            pl.BlockSpec((1, TN), lambda m, n, k: (0, n)),
        ]
        out_specs = pl.BlockSpec((TM, TN), lambda m, n, k: (m, n))
        out_shape = jax.ShapeDtypeStruct((Mp, Np), out_dtype)
        kernel = functools.partial(_mm_kernel, act=act)
        dims = ("parallel", "parallel", "arbitrary")
    f = pl.pallas_call(
        kernel,
        out_shape=out_shape,
        grid_spec=pltpu.PrefetchScalarGridSpec(
            num_scalar_prefetch=0,
            grid=grid,
            in_specs=in_specs,
            out_specs=out_specs,
            scratch_shapes=[pltpu.VMEM((TM, TN), jnp.float32)],
        ),
        compiler_params=pltpu.CompilerParams(dimension_semantics=dims),
    )
    return jax.jit(f)


def _m_tiling(M):
    if M >= 512:
        return _round_up(M, 512), 512
    if M >= 256:
        return _round_up(M, 256), 256
    Mp = _round_up(M, 16)
    return Mp, Mp


def matmul_fused(a, wmat, scale, shift, *, act, with_stats,
                 out_dtype=jnp.bfloat16):
    """a: (M, K) activations; wmat: (Kp, Np) pre-padded bf16 weights.

    Returns y of shape (Mp, Np) (plus (1, Np) sum / sumsq when with_stats)."""
    M, K = a.shape
    Kp, Np = wmat.shape
    assert Kp >= K
    Mp, TM = _m_tiling(M)
    TN = 256 if Np % 256 == 0 else 128
    TK = 256 if Kp % 256 == 0 else 128
    a = a.astype(jnp.bfloat16)
    if Mp != M or Kp != K:
        a = jnp.pad(a, ((0, Mp - M), (0, Kp - K)))
    fn = _mm_call(Mp, Kp, Np, TM, TK, TN, act, jnp.dtype(out_dtype).name,
                  with_stats)
    return fn(a, wmat, scale, shift)


# ----------------------------------------------------------------------------
# Pallas kernel 2: row-tiled fused per-channel scale/shift + activation
# (applies BatchNorm normalization + LeakyReLU after the stats are known).
# ----------------------------------------------------------------------------
def _ssa_kernel(x_ref, s_ref, t_ref, o_ref, *, act):
    y = x_ref[...].astype(jnp.float32) * s_ref[...] + t_ref[...]
    o_ref[...] = _apply_act(y, act).astype(o_ref.dtype)


@functools.lru_cache(maxsize=None)
def _ssa_call(Rp, Cp, TR, act, out_dtype_name):
    f = pl.pallas_call(
        functools.partial(_ssa_kernel, act=act),
        out_shape=jax.ShapeDtypeStruct((Rp, Cp), jnp.dtype(out_dtype_name)),
        grid_spec=pltpu.PrefetchScalarGridSpec(
            num_scalar_prefetch=0,
            grid=(Rp // TR,),
            in_specs=[
                pl.BlockSpec((TR, Cp), lambda r: (r, 0)),
                pl.BlockSpec((1, Cp), lambda r: (0, 0)),
                pl.BlockSpec((1, Cp), lambda r: (0, 0)),
            ],
            out_specs=pl.BlockSpec((TR, Cp), lambda r: (r, 0)),
        ),
        compiler_params=pltpu.CompilerParams(
            dimension_semantics=("parallel",)),
    )
    return jax.jit(f)


def ssa_apply(x, scale, shift, act, out_dtype=jnp.bfloat16):
    Rp, Cp = x.shape
    if Rp % 1024 == 0:
        TR = 1024
    elif Rp % 512 == 0:
        TR = 512
    else:
        TR = Rp
    return _ssa_call(Rp, Cp, TR, act, jnp.dtype(out_dtype).name)(
        x,
        jnp.asarray(scale, jnp.float32).reshape(1, Cp),
        jnp.asarray(shift, jnp.float32).reshape(1, Cp))


# ----------------------------------------------------------------------------
# conv = im2col (NHWC, channel-padded) + fused Pallas matmul
# ----------------------------------------------------------------------------
def im2col(x, k, stride, padding):
    """x: (B, H, W, C) -> (B*Ho*Wo, k*k*C), K index = (ki*k + kj)*C + c."""
    B, H, W, C = x.shape
    Ho = (H + 2 * padding - k) // stride + 1
    Wo = (W + 2 * padding - k) // stride + 1
    xp = jnp.pad(x, ((0, 0), (padding, padding), (padding, padding), (0, 0)))
    cols = []
    for ki in range(k):
        for kj in range(k):
            cols.append(xp[:, ki:ki + stride * Ho:stride,
                           kj:kj + stride * Wo:stride, :])
    pat = jnp.concatenate(cols, axis=-1)        # (B, Ho, Wo, k*k*C)
    # TODO(synk): the kh*kw patch copies could be folded into the matmul's K grid
    # with shifted-window index maps to avoid materializing im2col in HBM.
    return pat.reshape(B * Ho * Wo, k * k * C), Ho, Wo


def conv_act(x, layer, act):
    """SpectralNorm Conv2d + bias + activation (no BatchNorm)."""
    B = x.shape[0]
    a, Ho, Wo = im2col(x, layer['ksize'], layer['stride'], layer['padding'])
    M = a.shape[0]
    y = matmul_fused(a, layer['wmat'], layer['scale'], layer['shift'],
                     act=act, with_stats=False)
    if y.shape[0] != M:
        y = y[:M]
    return y.reshape(B, Ho, Wo, -1)


def conv_bn_lrelu(x, layer):
    """SpectralNorm Conv2d -> BatchNorm2d (batch stats) -> LeakyReLU(0.2)."""
    B = x.shape[0]
    a, Ho, Wo = im2col(x, layer['ksize'], layer['stride'], layer['padding'])
    M = a.shape[0]
    y, s_sum, s_sq = matmul_fused(a, layer['wmat'], layer['scale'],
                                  layer['shift'], act=ACT_NONE,
                                  with_stats=True)
    cnt = jnp.float32(M)
    mean = s_sum / cnt
    var = jnp.maximum(s_sq / cnt - mean * mean, 0.0)
    sc = layer['gamma'][None, :] * jax.lax.rsqrt(var + BN_EPS)
    sh = layer['beta'][None, :] - mean * sc
    y = ssa_apply(y, sc, sh, ACT_LRELU)
    if y.shape[0] != M:
        y = y[:M]
    return y.reshape(B, Ho, Wo, -1)


def linear(x2, layer, act):
    M = x2.shape[0]
    y = matmul_fused(x2, layer['wmat'], layer['scale'], layer['shift'],
                     act=act, with_stats=False)
    return y[:M]


# ----------------------------------------------------------------------------
# parameter init (deterministic, synthetic; weights pre-padded/pre-cast once)
# ----------------------------------------------------------------------------
class KeyGen:
    def __init__(self, seed=0):
        self.key = jax.random.PRNGKey(seed)

    def __call__(self):
        self.key, k = jax.random.split(self.key)
        return k


def spectral_normalize(w, n_iter=3):
    wm = w.reshape(w.shape[0], -1)
    u = jnp.ones((wm.shape[0],), jnp.float32)
    u = u / jnp.linalg.norm(u)
    v = None
    for _ in range(n_iter):
        v = wm.T @ u
        v = v / (jnp.linalg.norm(v) + 1e-12)
        u = wm @ v
        u = u / (jnp.linalg.norm(u) + 1e-12)
    sigma = u @ (wm @ v)
    return w / sigma


def make_conv_layer(kg, cin_real, cin_pad, cout, k, stride, padding,
                    *, sn=True, bn=True):
    fan_in = cin_real * k * k
    w = jax.random.normal(kg(), (cout, cin_real, k, k), jnp.float32)
    w = w * (1.0 / math.sqrt(fan_in))
    if sn:
        w = spectral_normalize(w)
    Np = _round_up(cout, 128)
    wt = jnp.transpose(w, (2, 3, 1, 0))          # (k, k, cin, cout)
    wt = jnp.pad(wt, ((0, 0), (0, 0),
                      (0, cin_pad - cin_real), (0, Np - cout)))
    K = k * k * cin_pad
    wmat = wt.reshape(K, Np)
    Kp = _round_up(K, 128)
    if Kp != K:
        wmat = jnp.pad(wmat, ((0, Kp - K), (0, 0)))
    layer = dict(wmat=wmat.astype(jnp.bfloat16),
                 ksize=k, stride=stride, padding=padding)
    if bn:
        # conv bias is cancelled exactly by train-mode BatchNorm; epilogue is identity.
        layer['scale'] = jnp.ones((1, Np), jnp.float32)
        layer['shift'] = jnp.zeros((1, Np), jnp.float32)
        layer['gamma'] = jnp.zeros((Np,), jnp.float32).at[:cout].set(1.0)
        layer['beta'] = jnp.zeros((Np,), jnp.float32)
    else:
        b = jax.random.normal(kg(), (cout,), jnp.float32) * 0.01
        layer['scale'] = jnp.zeros((1, Np), jnp.float32).at[0, :cout].set(1.0)
        layer['shift'] = jnp.zeros((1, Np), jnp.float32).at[0, :cout].set(b)
    return layer


def make_linear_layer(kg, fin, fout):
    wT = jax.random.normal(kg(), (fin, fout), jnp.float32)
    wT = wT * (1.0 / math.sqrt(fin))
    b = jax.random.normal(kg(), (fout,), jnp.float32) * 0.01
    Kp, Np = _round_up(fin, 128), _round_up(fout, 128)
    if (Kp, Np) != (fin, fout):
        wT = jnp.pad(wT, ((0, Kp - fin), (0, Np - fout)))
    return dict(
        wmat=wT.astype(jnp.bfloat16),
        scale=jnp.zeros((1, Np), jnp.float32).at[0, :fout].set(1.0),
        shift=jnp.zeros((1, Np), jnp.float32).at[0, :fout].set(b))


def init_params(seed=0, in_dim=3, num_classes=16):
    kg = KeyGen(seed)
    P = {}
    # conv1
    P['c1_1'] = make_conv_layer(kg, in_dim, in_dim, 64, 3, 1, 1, bn=False)
    P['c1_2'] = make_conv_layer(kg, 64, 128, 64, 3, 1, 1)
    # conv2
    P['c2_1'] = make_conv_layer(kg, 64, 128, 128, 3, 2, 1)
    P['c2_2'] = make_conv_layer(kg, 128, 128, 128, 3, 1, 1)
    # conv3
    P['c3_1'] = make_conv_layer(kg, 128, 128, 256, 3, 2, 1)
    P['c3_2'] = make_conv_layer(kg, 256, 256, 256, 3, 1, 1)
    P['c3_3'] = make_conv_layer(kg, 256, 256, 256, 3, 1, 1)
    # conv4
    P['c4_1'] = make_conv_layer(kg, 256, 256, 512, 3, 2, 1)
    P['c4_2'] = make_conv_layer(kg, 512, 512, 512, 3, 1, 1)
    P['c4_3'] = make_conv_layer(kg, 512, 512, 512, 3, 1, 1)
    # conv5
    P['c5_1'] = make_conv_layer(kg, 512, 512, 512, 3, 2, 1)
    P['c5_2'] = make_conv_layer(kg, 512, 512, 512, 3, 1, 1)
    P['c5_3'] = make_conv_layer(kg, 512, 512, 512, 3, 1, 1)
    # conv6
    P['c6'] = make_conv_layer(kg, 512, 512, 512, 3, 2, 1, bn=False)
    # category classifier
    P['fc1'] = make_linear_layer(kg, 512 * 8 * 8, 4096)
    P['fc2'] = make_linear_layer(kg, 4096, 4096)
    P['fc3'] = make_linear_layer(kg, 4096, num_classes)
    # gan regressor (4x4 convs)
    P['gan1'] = make_conv_layer(kg, 512, 512, 256, 4, 1, 1)
    P['gan2'] = make_conv_layer(kg, 256, 256, 1, 4, 1, 1, bn=False)
    # noise regressor (3x3 convs)
    P['noise1'] = make_conv_layer(kg, 512, 512, 256, 3, 1, 1)
    P['noise2'] = make_conv_layer(kg, 256, 256, 1, 3, 1, 1, bn=False)
    P['num_classes'] = num_classes
    return P


# ----------------------------------------------------------------------------
# LabDiscriminator forward
# ----------------------------------------------------------------------------
def lab_discriminator_forward(params, l, ab):
    B = l.shape[0]
    lab = jnp.concatenate([l, ab], axis=1)                      # (B, 3, H, W) NCHW
    x = jnp.transpose(lab, (0, 2, 3, 1)).astype(jnp.bfloat16)   # NHWC

    x = conv_act(x, params['c1_1'], ACT_LRELU)
    conv1 = conv_bn_lrelu(x, params['c1_2'])

    x = conv_bn_lrelu(conv1, params['c2_1'])
    conv2 = conv_bn_lrelu(x, params['c2_2'])

    x = conv_bn_lrelu(conv2, params['c3_1'])
    x = conv_bn_lrelu(x, params['c3_2'])
    conv3 = conv_bn_lrelu(x, params['c3_3'])

    x = conv_bn_lrelu(conv3, params['c4_1'])
    x = conv_bn_lrelu(x, params['c4_2'])
    conv4 = conv_bn_lrelu(x, params['c4_3'])

    x = conv_bn_lrelu(conv4, params['c5_1'])
    x = conv_bn_lrelu(x, params['c5_2'])
    conv5 = conv_bn_lrelu(x, params['c5_3'])

    conv6 = conv_act(conv5, params['c6'], ACT_LRELU)            # (B, 8, 8, 512)

    # category classifier (PyTorch flattens in NCHW order).
    # TODO(synk): nn.Dropout treated as identity (eval); training-mode dropout
    # would need a pltpu PRNG mask in the epilogue.
    feat = jnp.transpose(conv6, (0, 3, 1, 2)).reshape(B, -1)    # (B, 512*8*8)
    h = linear(feat, params['fc1'], ACT_RELU)
    h = linear(h, params['fc2'], ACT_RELU)
    category = linear(h, params['fc3'], ACT_NONE)[:, :params['num_classes']]

    g = conv_bn_lrelu(conv4, params['gan1'])
    gan_feature = conv_act(g, params['gan2'], ACT_NONE)

    r = conv_bn_lrelu(conv4, params['noise1'])
    recon_z = conv_act(r, params['noise2'], ACT_NONE)

    def to_nchw(t, c_real):
        return jnp.transpose(t[..., :c_real], (0, 3, 1, 2)).astype(jnp.float32)

    return (to_nchw(conv1, 64), to_nchw(conv2, 128), to_nchw(conv3, 256),
            to_nchw(conv4, 512), to_nchw(gan_feature, 1),
            category.astype(jnp.float32), to_nchw(recon_z, 1))


# ----------------------------------------------------------------------------
if __name__ == "__main__":
    key = jax.random.PRNGKey(0)
    kl, kab = jax.random.split(key)
    B = 1
    # 256x256 is required: category_classifier expects conv6 flattened to 512*8*8.
    H = W = 256
    l = jax.random.normal(kl, (B, 1, H, W), jnp.float32)
    ab = jax.random.normal(kab, (B, 2, H, W), jnp.float32)

    params = init_params(seed=0, in_dim=3, num_classes=16)

    outs = lab_discriminator_forward(params, l, ab)
    outs = jax.block_until_ready(outs)
    conv1, conv2, conv3, conv4, gan_feature, category_feature, recon_z = outs

    assert conv1.shape == (B, 64, 256, 256), conv1.shape
    assert conv2.shape == (B, 128, 128, 128), conv2.shape
    assert conv3.shape == (B, 256, 64, 64), conv3.shape
    assert conv4.shape == (B, 512, 32, 32), conv4.shape
    assert gan_feature.shape == (B, 1, 30, 30), gan_feature.shape
    assert category_feature.shape == (B, 16), category_feature.shape
    assert recon_z.shape == (B, 1, 32, 32), recon_z.shape
    for t in outs:
        assert bool(jnp.all(jnp.isfinite(t)))
    print("KERNEL_OK")
</pallas_src>

<mosaic_0001>
module attributes {stable_mosaic.version = 11 : i64} {
  func.func @_mm_kernel(%arg0: i32, %arg1: i32, %arg2: i32, %arg3: memref<512x128xbf16, #tpu.memory_space<vmem>>, %arg4: memref<128x128xbf16, #tpu.memory_space<vmem>>, %arg5: memref<1x128xf32, #tpu.memory_space<vmem>>, %arg6: memref<1x128xf32, #tpu.memory_space<vmem>>, %arg7: memref<512x128xbf16, #tpu.memory_space<vmem>>, %arg8: memref<512x128xf32, #tpu.memory_space<vmem>>) attributes {dimension_semantics = [#tpu.dimension_semantics<parallel>, #tpu.dimension_semantics<parallel>, #tpu.dimension_semantics<arbitrary>], iteration_bounds = array<i64: 128, 1, 1>, scalar_prefetch = 0 : i64, scratch_operands = 1 : i64, tpu.core_type = #tpu.core_type<tc>, window_params = [{transform_indices = @transform_0, window_bounds = array<i64: 512, 128>}, {transform_indices = @transform_1, window_bounds = array<i64: 128, 128>}, {transform_indices = @transform_2, window_bounds = array<i64: 1, 128>}, {transform_indices = @transform_3, window_bounds = array<i64: 1, 128>}, {transform_indices = @transform_4, window_bounds = array<i64: 512, 128>}]} {
    %c0_i32 = arith.constant 0 : i32
    %0 = arith.cmpi eq, %arg2, %c0_i32 : i32
    %1 = arith.extui %0 : i1 to i32
    %c0_i32_0 = arith.constant 0 : i32
    %2 = arith.cmpi ne, %1, %c0_i32_0 : i32
    scf.if %2 {
      %cst_10 = arith.constant 0.000000e+00 : f32
      %12 = vector.broadcast %cst_10 : f32 to vector<512x128xf32>
      %c0_11 = arith.constant 0 : index
      %c0_12 = arith.constant 0 : index
      %13 = vector.load %arg8[%c0_11, %c0_12] : memref<512x128xf32, #tpu.memory_space<vmem>>, vector<512x128xf32>
      tpu.vector_store %arg8[%c0_11, %c0_12], %12 {strides = array<i32>} : memref<512x128xf32, #tpu.memory_space<vmem>>, vector<512x128xf32>,
    } else {
    }
    %c0 = arith.constant 0 : index
    %c0_1 = arith.constant 0 : index
    %3 = vector.load %arg8[%c0, %c0_1] : memref<512x128xf32, #tpu.memory_space<vmem>>, vector<512x128xf32>
    %c0_2 = arith.constant 0 : index
    %c0_3 = arith.constant 0 : index
    %4 = vector.load %arg3[%c0_2, %c0_3] : memref<512x128xbf16, #tpu.memory_space<vmem>>, vector<512x128xbf16>
    %c0_4 = arith.constant 0 : index
    %c0_5 = arith.constant 0 : index
    %5 = vector.load %arg4[%c0_4, %c0_5] : memref<128x128xbf16, #tpu.memory_space<vmem>>, vector<128x128xbf16>
    %cst = arith.constant dense<0.000000e+00> : vector<512x128xf32>
    %6 = tpu.matmul %4, %5, %cst {dimension_numbers = #tpu.dot_dimension_numbers<[1], [0], [0], [1], [0, 0, 1, 1], [], []>} : vector<512x128xbf16>, vector<128x128xbf16>, vector<512x128xf32> -> vector<512x128xf32>
    %7 = arith.addf %3, %6 : vector<512x128xf32>
    %c0_6 = arith.constant 0 : index
    %c0_7 = arith.constant 0 : index
    %8 = vector.load %arg8[%c0_6, %c0_7] : memref<512x128xf32, #tpu.memory_space<vmem>>, vector<512x128xf32>
    tpu.vector_store %arg8[%c0_6, %c0_7], %7 {strides = array<i32>} : memref<512x128xf32, #tpu.memory_space<vmem>>, vector<512x128xf32>,
    %c0_i32_8 = arith.constant 0 : i32
    %9 = arith.cmpi eq, %arg2, %c0_i32_8 : i32
    %10 = arith.extui %9 : i1 to i32
    %c0_i32_9 = arith.constant 0 : i32
    %11 = arith.cmpi ne, %10, %c0_i32_9 : i32
    scf.if %11 {
      %c0_10 = arith.constant 0 : index
      %c0_11 = arith.constant 0 : index
      %12 = vector.load %arg8[%c0_10, %c0_11] : memref<512x128xf32, #tpu.memory_space<vmem>>, vector<512x128xf32>
      %c0_12 = arith.constant 0 : index
      %c0_13 = arith.constant 0 : index
      %13 = vector.load %arg5[%c0_12, %c0_13] : memref<1x128xf32, #tpu.memory_space<vmem>>, vector<1x128xf32>
      %14 = vector.broadcast %13 : vector<1x128xf32> to vector<512x128xf32>
      %15 = arith.mulf %12, %14 : vector<512x128xf32>
      %c0_14 = arith.constant 0 : index
      %c0_15 = arith.constant 0 : index
      %16 = vector.load %arg6[%c0_14, %c0_15] : memref<1x128xf32, #tpu.memory_space<vmem>>, vector<1x128xf32>
      %17 = vector.broadcast %16 : vector<1x128xf32> to vector<512x128xf32>
      %18 = arith.addf %15, %17 : vector<512x128xf32>
      %cst_16 = arith.constant 0.000000e+00 : f32
      %19 = vector.broadcast %cst_16 : f32 to vector<512x128xf32>
      %20 = arith.cmpf oge, %18, %19 : vector<512x128xf32>
      %cst_17 = arith.constant 2.000000e-01 : f32
      %21 = vector.broadcast %cst_17 : f32 to vector<512x128xf32>
      %22 = arith.mulf %21, %18 : vector<512x128xf32>
      %23 = arith.select %20, %18, %22 : vector<512x128xi1>, vector<512x128xf32>
      %24 = arith.truncf %23 : vector<512x128xf32> to vector<512x128xbf16>
      %c0_18 = arith.constant 0 : index
      %c0_19 = arith.constant 0 : index
      %25 = vector.load %arg7[%c0_18, %c0_19] : memref<512x128xbf16, #tpu.memory_space<vmem>>, vector<512x128xbf16>
      tpu.vector_store %arg7[%c0_18, %c0_19], %24 {strides = array<i32>} : memref<512x128xbf16, #tpu.memory_space<vmem>>, vector<512x128xbf16>,
    } else {
    }
    return
  }
  func.func @transform_0(%arg0: i32, %arg1: i32, %arg2: i32) -> (i32, i32) {
    %c0_i32 = arith.constant 0 : i32
    return %arg0, %arg2 : i32, i32
  }
  func.func @transform_1(%arg0: i32, %arg1: i32, %arg2: i32) -> (i32, i32) {
    %c0_i32 = arith.constant 0 : i32
    return %arg2, %arg1 : i32, i32
  }
  func.func @transform_2(%arg0: i32, %arg1: i32, %arg2: i32) -> (i32, i32) {
    %c0_i32 = arith.constant 0 : i32
    %c0_i32_0 = arith.constant 0 : i32
    return %c0_i32, %arg1 : i32, i32
  }
  func.func @transform_3(%arg0: i32, %arg1: i32, %arg2: i32) -> (i32, i32) {
    %c0_i32 = arith.constant 0 : i32
    %c0_i32_0 = arith.constant 0 : i32
    return %c0_i32, %arg1 : i32, i32
  }
  func.func @transform_4(%arg0: i32, %arg1: i32, %arg2: i32) -> (i32, i32) {
    %c0_i32 = arith.constant 0 : i32
    return %arg0, %arg1 : i32, i32
  }
}

</mosaic_0001>

<bundles_post_ra>
// kernel: tpu_custom_call.1
= control target key start
LH: loop header
LB: loop body
LE: loop exit
PB: predicated region body
PF: predicated region fallthrough
CT: control target
= control target key end

     0   :  { %9 = vsyncpa [#allocation4], 0  ;;  %s3524_s0 = inlined_call_operand.hbm [shape: bf16[65536,128], index: 0, kind: input, shape index: {}]   ;;  %s3525_s1 = inlined_call_operand.hbm [shape: bf16[128,128], index: 1, kind: input, shape index: {}]   ;;  %s3526_s2 = inlined_call_operand.hbm [shape: f32[1,128], index: 2, kind: input, shape index: {}]   ;;  %s3527_s3 = inlined_call_operand.hbm [shape: f32[1,128], index: 3, kind: input, shape index: {}]   ;;  %s3528_s4 = inlined_call_operand.hbm [shape: bf16[65536,128], index: 4, kind: output, shape index: {}]  }
   0x1   :  { %11 = vsyncpa [#allocation4 + $0x1], 0 }
   0x2   :  { %12 = vsyncpa [#allocation7], 0 }
   0x3   :  { %13 = vsyncpa [#allocation10], 0 }
   0x4   :  { %14 = vsyncpa [#allocation5], 0 }
   0x5   :  { %16 = vsyncpa [#allocation5 + $0x1], 0  ;;  %s2936_s15 = smov 0   ;;  %s2938_s16 = smov 0  }
   0x6   :  { %s2940_s17 = smov 0   ;;  %s2942_s18 = smov 0  }
   0x7   :  { %s2944_s19 = smov 0   ;;  %s2946_s20 = smov 0  }
   0x8 LB: > { %s2039_s21 = sadd.s32 4294967295, %s2900_s20   ;;  %s2040_s22 = sadd.s32 4294967294, %s2900_s20   ;;  %s2900_s20 = sphi %s2946_s20, %s22_s20   ;;  %s2896_s19 = sphi %s2944_s19, %s3554_s19   ;;  %s2892_s18 = sphi %s2942_s18, %s3553_s18   ;;  %s2888_s17 = sphi %s2940_s17, %s3552_s17   ;;  %s2884_s16 = sphi %s2938_s16, %s3551_s16   ;;  %s2880_s15 = sphi %s2936_s15, %s3550_s15  }
   0x9   : > { %p63_p0 = scmp.ne.s32.totalorder %s2884_s16, %s2880_s15  ;;  %p2970_p1 = scmp.eq.s32.totalorder %s2039_s21, 0 }
   0xa   : > { %p2974_p2 = scmp.eq.s32.totalorder %s2039_s21, 127  ;;  %p175_p3 = scmp.eq.s32.totalorder %s2040_s22, 127 }
   0xb   : > { %s3534_s23 = scalar_select %p2970_p1, 1, 0 }
   0xc   : > { %s3535_s24 = scalar_select %p2974_p2, 1, 0 }
   0xd   : > { %p2980_p4 = por %p2970_p1, %p63_p0  ;;  %p2041_p5 = scmp.ge.s32.totalorder %s2900_s20, 1 }
   0xe   : > { %p2985_p6 = por %p175_p3, %p63_p0  ;;  %p182_p7 = scmp.lt.s32.totalorder %s2900_s20, 129 }
   0xf   : > { %s3536_s25 = scalar_select %p2980_p4, 1, 0 }
  0x10   : > { %s3537_s26 = scalar_select %p2985_p6, 1, 0 }
  0x11   : > { %p2990_p8 = pnand %p2041_p5, %p182_p7  ;;  %s2902_s28 = smov [#allocation6]  }
  0x12   : > { %3538 = sst [smem:[#allocation16_spill]] %s3537_s26  ;;  %s198_s29 = sshll.u32 %s2902_s28, 4  ;;  %s2994_s29 = int_to_ptr.vmem [resolvable:$true] %s198_s29 }
  0x13   : > { %s3539_s27 = scalar_select %p2990_p8, 1, 0 }
  0x14   : > { %p2575_p9 = pneg %p2990_p8  ;;  %s2903_s5 = smov [#allocation8]  }
  0x15   : > { %s214_s6 = sshll.u32 %s2903_s5, 4  ;;  %s2904_s7 = smov [#allocation9]   ;;  %s3004_s6 = int_to_ptr.vmem [resolvable:$true] %s214_s6 }
  0x16   : > { %p3000_p10 = pnand %p2575_p9, %p2970_p1  ;;  %s3006_s8 = sshll.u32 %s2904_s7, 4  ;;  %s228_s8 = int_to_ptr.vmem [resolvable:$true] %s3006_s8 }
  0x17   : > { %s2696_s11 = scalar_lea.hbm %s3525_s1, 1024 }
  0x18   : > { %p2697_p11 = scmp.ne.s32.totalorder %s3525_s1, %s2696_s11  ;;  %p3016_p12 = pneg %p3000_p10 }
  0x19   : > { %p2703_p3 = scmp.lt.u32.totalorder %s2696_s11, %s3525_s1 }
  0x1a   : > { %p2699_p13 = pnand %p3016_p12, %p2697_p11 }
  0x1c   : > { %p2700_p0 = pneg %p2699_p13 }
  0x1e   : > { %p2705_p5 = pnand %p2703_p3, %p2700_p0 }
  0x20   : > { %2708 = shalt.err (!%p2705_p5)
}
  0x21   : > { %s2709_s28 = scalar_lea.vmem %s2994_s29, 1024  ;;  %p2717_p1 = scmp.lt.s32.totalorder %s2994_s29, %s2994_s29 }
  0x22   : > { %p2710_p7 = scmp.ne.s32.totalorder %s2994_s29, %s2709_s28  ;;  %p2718_p4 = scmp.lt.s32.totalorder %s2709_s28, %s2709_s28 }
  0x24   : > { %p2712_p9 = pnand %p2710_p7, %p3016_p12  ;;  %p2719_p11 = por %p2718_p4, %p2717_p1 }
  0x26   : > { %p2713_p6 = pneg %p2712_p9 }
  0x28   : > { %p2720_p13 = pnand %p2719_p11, %p2713_p6 }
  0x2a   : > { %2723 = shalt.err (!%p2720_p13)
}
  0x2b   : > { %s2905_s5 = smov 64   ;;  %s2906_s7 = smov 4  }
  0x2c   : > { %2578 = dma.hbm_to_vmem [thread:$0]  (!%p3000_p10), %s3525_s1, 1024, %s2994_s29, [#allocation7], %s2905_s5, %s2905_s5, %s2906_s7  }
  0x2d   : > { %s2724_s13 = scalar_lea.hbm %s3526_s2, 16 }
  0x2e   : > { %p2725_p1 = scmp.ne.s32.totalorder %s3526_s2, %s2724_s13  ;;  %p2731_p0 = scmp.lt.u32.totalorder %s2724_s13, %s3526_s2 }
  0x30   : > { %p2727_p4 = pnand %p2725_p1, %p3016_p12 }
  0x32   : > { %p2728_p6 = pneg %p2727_p4 }
  0x34   : > { %p2733_p3 = pnand %p2731_p0, %p2728_p6 }
  0x36   : > { %2736 = shalt.err (!%p2733_p3)
}
  0x37   : > { %s2737_s29 = scalar_lea.vmem %s3004_s6, 16  ;;  %s2744_s9 = scalar_lea.vmem %s3004_s6, 32 }
  0x38   : > { %p2738_p5 = scmp.ne.s32.totalorder %s3004_s6, %s2737_s29  ;;  %p2745_p11 = scmp.lt.s32.totalorder %s3004_s6, %s3004_s6 }
  0x39   : > { %p2746_p13 = scmp.lt.s32.totalorder %s2744_s9, %s2737_s29 }
  0x3a   : > { %p2740_p7 = pnand %p2738_p5, %p3016_p12 }
  0x3b   : > { %p2747_p1 = por %p2746_p13, %p2745_p11 }
  0x3c   : > { %p2741_p9 = pneg %p2740_p7 }
  0x3e   : > { %p2748_p4 = pnand %p2747_p1, %p2741_p9 }
  0x40   : > { %2751 = shalt.err (!%p2748_p4)
}
  0x41   : > { %2581 = dma.hbm_to_vmem [thread:$0]  (!%p3000_p10), %s3526_s2, 16, %s3004_s6, [#allocation7]  }
  0x42   : > { %s2752_s13 = scalar_lea.hbm %s3527_s3, 16 }
  0x43   : > { %p2753_p6 = scmp.ne.s32.totalorder %s3527_s3, %s2752_s13  ;;  %p2759_p5 = scmp.lt.u32.totalorder %s2752_s13, %s3527_s3 }
  0x45   : > { %p2755_p0 = pnand %p2753_p6, %p3016_p12 }
  0x47   : > { %p2756_p3 = pneg %p2755_p0 }
  0x49   : > { %p2761_p7 = pnand %p2759_p5, %p2756_p3 }
  0x4b   : > { %2764 = shalt.err (!%p2761_p7)
}
  0x4c   : > { %s2765_s9 = scalar_lea.vmem %s228_s8, 16  ;;  %s2772_s6 = scalar_lea.vmem %s228_s8, 32 }
  0x4d   : > { %p2766_p9 = scmp.ne.s32.totalorder %s228_s8, %s2765_s9  ;;  %p2773_p1 = scmp.lt.s32.totalorder %s228_s8, %s228_s8 }
  0x4e   : > { %p2774_p4 = scmp.lt.s32.totalorder %s2772_s6, %s2765_s9 }
  0x4f   : > { %p2768_p11 = pnand %p2766_p9, %p3016_p12 }
  0x50   : > { %p2775_p8 = por %p2774_p4, %p2773_p1 }
  0x51   : > { %p2769_p13 = pneg %p2768_p11 }
  0x53   : > { %p2776_p2 = pnand %p2775_p8, %p2769_p13 }
  0x55   : > { %2779 = shalt.err (!%p2776_p2)
}
  0x56   : > { %2584 = dma.hbm_to_vmem [thread:$0]  (!%p3000_p10), %s3527_s3, 16, %s228_s8, [#allocation10]  }
  0x57   : > { %s50_s14 = sadd.s32 1, %s2888_s17  ;;  %s41_s11 = sadd.s32 1, %s2896_s19 }
  0x58   : > { %p57_p2 = scmp.ne.s32.totalorder %s2888_s17, %s2884_s16  ;;  %p43_p8 = scmp.ge.s32.totalorder %s41_s11, 128 }
  0x59   : > { %p58_p12 = scmp.eq.s32.totalorder %s2900_s20, 0  ;;  %p3542_p6 = scmp.ne.s32.totalorder %s3535_s24, 0 }
  0x5a   : > { %p2596_p3 = scmp.lt.s32.totalorder %s2900_s20, 128  ;;  %s3556_s11 = smov (%p43_p8, %s41_s11), 0 }
  0x5b   : > { %p3090_p0 = por %p3542_p6, %p57_p2  ;;  %p59_p5 = por %p58_p12, %p57_p2 }
  0x5c   : > { %s238_s12 = sand.u32 1, %s2888_s17   ;;  %s45_s13 = ssub.s32 %s2896_s19, %s3556_s11 }
  0x5d   : > { %p48_p7 = scmp.eq.s32.totalorder %s45_s13, 0  ;;  %s2046_s8 = sshll.u32 %s238_s12, 8 }
  0x5e   : > { %s2166_s21 = sshll.u32 %s2896_s19, 12  ;;  %s242_s9 = scalar_lea.vmem [#allocation3], %s2046_s8 }
  0x5f   : > { %s3102_s22 = scalar_select %p48_p7, %s2888_s17, %s50_s14  }
  0x60   : > { %s3107_s24 = scalar_lea.hbm %s3524_s0, %s2166_s21  ;;  %s250_s6 = sshll.u32 %s242_s9, 4  ;;  %s3109_s6 = int_to_ptr.vmem [resolvable:$true] %s250_s6 }
  0x61   : > { %p3113_p10 = pnand %p2596_p3, %p59_p5  ;;  %s3117_s10 = scalar_lea.sflag [#allocation4], %s238_s12 }
  0x62   : > { %s2780_s14 = scalar_lea.hbm %s3107_s24, 4096  ;;  %s2785_s21 = scalar_lea.hbm %s3524_s0, 524288 }
  0x63   : > { %p2781_p9 = scmp.ne.s32.totalorder %s3107_s24, %s2780_s14  ;;  %p2782_p11 = pneg %p3113_p10 }
  0x64   : > { %p2786_p4 = scmp.lt.u32.totalorder %s3107_s24, %s3524_s0  ;;  %p2787_p2 = scmp.lt.u32.totalorder %s2785_s21, %s2780_s14 }
  0x65   : > { %p2783_p13 = pnand %p2782_p11, %p2781_p9  ;;  %p2789_p12 = scmp.lt.u32.totalorder %s2780_s14, %s3107_s24 }
  0x66   : > { %p2788_p8 = por %p2787_p2, %p2786_p4 }
  0x67   : > { %p2784_p1 = pneg %p2783_p13 }
  0x68   : > { %p2790_p6 = por %p2789_p12, %p2788_p8 }
  0x6a   : > { %p2791_p3 = pnand %p2790_p6, %p2784_p1 }
  0x6c   : > { %2794 = shalt.err (!%p2791_p3)
}
  0x6d   : > { %s2795_s12 = scalar_lea.vmem %s3109_s6, 4096  ;;  %s2907_s9 = smov [#allocation3]  }
  0x6e   : > { %p2796_p5 = scmp.ne.s32.totalorder %s3109_s6, %s2795_s12  ;;  %s2800_s13 = sshll.u32 %s2907_s9, 4  ;;  %s2801_s13 = int_to_ptr.vmem [resolvable:$false] %s2800_s13 }
  0x6f   : > { %s2802_s8 = scalar_lea.vmem %s2801_s13, 8192  ;;  %p2803_p13 = scmp.lt.s32.totalorder %s3109_s6, %s2801_s13 }
  0x70   : > { %p2798_p7 = pnand %p2796_p5, %p2782_p11  ;;  %p2804_p4 = scmp.lt.s32.totalorder %s2802_s8, %s2795_s12 }
  0x72   : > { %p2799_p9 = pneg %p2798_p7  ;;  %p2805_p2 = por %p2804_p4, %p2803_p13 }
  0x74   : > { %p2806_p8 = pnand %p2805_p2, %p2799_p9 }
  0x76   : > { %2809 = shalt.err (!%p2806_p8)
}
  0x77   : > { %2588 = dma.hbm_to_vmem [thread:$0]  (!%p3113_p10), %s3107_s24, 4096, %s3109_s6, %s3117_s10, %s2905_s5, %s2905_s5, %s2906_s7  }
  0x78   : > { %p3545_p11 = scmp.ne.s32.totalorder %s3539_s27, 0 }
  0x79   : > { %s3151_s14 = sand.u32 (!%p3545_p11), 1, %s2884_s16   ;;  %p3546_p1 = scmp.ne.s32.totalorder (!%p3545_p11), %s3536_s25, 0 }
  0x7a   : > { %262 = sbr.rel (%p3545_p11) target bundleno = 488 (0x1e8), region = 36  ;;  %s2050_s21 = sshll.u32 (!%p3545_p11), %s3151_s14, 8 }
  0x7b   : > { %s265_s28 = scalar_lea.sflag (!%p3545_p11), [#allocation4], %s3151_s14  ;;  %s3157_s26 = scalar_lea.vmem (!%p3545_p11), [#allocation3], %s2050_s21 }
  0x81   : > { %2863 = dma.done.wait (%p3546_p1), %s265_s28, 4096  }
  0x82   : > { %2865 = vsyncadd (%p3546_p1), %s265_s28, 4294963200  ;;  %p3547_p10 = scmp.ne.s32.totalorder %s3534_s23, 0 }
  0x84   : > { %2867 = dma.done.wait (%p3547_p10), [#allocation7], 1040  }
  0x85   : > { %2869 = vsyncadd (%p3547_p10), [#allocation7], 4294966256 }
  0x86   : > { %2871 = dma.done.wait (%p3547_p10), [#allocation10], 16  }
  0x87   : > { %2873 = vsyncadd (%p3547_p10), [#allocation10], 4294967280  ;;  %v2656_v0 = vld [vmem:[#allocation6] sm:$0xff]   ;;  %v2657_v1 = vld [vmem:[#allocation6 + $0x8] sm:$0xff]   ;;  %s3229_s23 = scalar_lea.vmem [#allocation11], %s2050_s21  ;;  %s2231_s25 = sshll.u32 %s2892_s18, 12 }
  0x88   : > { %2463 = vmatprep.subr.bf16.mxu0 %v2656_v0  ;;  %2543 = vmatprep.subr.bf16.mxu1 %v2656_v0  ;;  %v2658_v2 = vld [vmem:[#allocation6 + $0x10] sm:$0xff]   ;;  %v2659_v3 = vld [vmem:[#allocation6 + $0x18] sm:$0xff]   ;;  %v2664_v4 = vld [vmem:[%s3157_s26] sm:$0xff]   ;;  %s1914_s27 = sshll.u32 %s3229_s23, 4  ;;  %s3472_s24 = scalar_lea.hbm %s3528_s4, %s2231_s25  ;;  %s3474_s27 = int_to_ptr.vmem [resolvable:$true] %s1914_s27 }
  0x89   : > { %2464 = vmatpush3.bf16.msra.mxu0 %v2656_v0  ;;  %2551 = vmatpush3.bf16.msra.mxu1 %v2656_v0  ;;  %v2665_v5 = vld [vmem:[%s3157_s26 + $0x80] sm:$0xff]   ;;  %v2661_v7 = vld [vmem:[#allocation6 + $0x28] sm:$0xff]   ;;  %v2662_v8 = vld [vmem:[#allocation6 + $0x30] sm:$0xff]   ;;  %s1900_s18 = scalar_lea.sflag [#allocation5], %s3151_s14  ;;  %s2810_s6 = scalar_lea.vmem %s3474_s27, 4096 }
  0x8a   : > { %2465 = vmatprep.subr.bf16.mxu0 %v2657_v1  ;;  %2544 = vmatprep.subr.bf16.mxu1 %v2657_v1  ;;  %v2660_v6 = vld [vmem:[#allocation6 + $0x20] sm:$0xff]   ;;  %v2663_v9 = vld [vmem:[#allocation6 + $0x38] sm:$0xff]   ;;  %v2666_v10 = vld [vmem:[%s3157_s26 + $0x8] sm:$0xff]   ;;  %p2811_p12 = scmp.ne.s32.totalorder %s3474_s27, %s2810_s6  ;;  %s2908_s10 = smov [#allocation11]  }
  0x8b   : > { %2479 = vmatprep.mubr.bf16.mxu0 %v2664_v4  ;;  %2511 = vmatprep.mubr.bf16.mxu1 %v2665_v5  ;;  %v2667_v11 = vld [vmem:[%s3157_s26 + $0x88] sm:$0xff]   ;;  %v2668_v12 = vld [vmem:[%s3157_s26 + $0x10] sm:$0xff]   ;;  %v2670_v14 = vld [vmem:[%s3157_s26 + $0x18] sm:$0xff]   ;;  %s2814_s29 = sshll.u32 %s2908_s10, 4  ;;  %s2815_s29 = int_to_ptr.vmem [resolvable:$false] %s2814_s29 }
  0x8c   : > { %v2669_v13 = vld [vmem:[%s3157_s26 + $0x90] sm:$0xff]   ;;  %v2671_v15 = vld [vmem:[%s3157_s26 + $0x98] sm:$0xff]   ;;  %v2672_v16 = vld [vmem:[%s3157_s26 + $0x20] sm:$0xff]   ;;  %p2812_p6 = pnand %p2811_p12, %p3090_p0  ;;  %s2816_s12 = scalar_lea.vmem %s2815_s29, 8192 }
  0x8d   : > { %2466 = vmatpush3.bf16.msra.mxu0 %v2657_v1  ;;  %2552 = vmatpush3.bf16.msra.mxu1 %v2657_v1  ;;  %v2673_v17 = vld [vmem:[%s3157_s26 + $0xa0] sm:$0xff]   ;;  %v2674_v18 = vld [vmem:[%s3157_s26 + $0x28] sm:$0xff]   ;;  %v2676_v20 = vld [vmem:[%s3157_s26 + $0x30] sm:$0xff]   ;;  %p2817_p5 = scmp.lt.s32.totalorder %s3474_s27, %s2815_s29  ;;  %p2818_p7 = scmp.lt.s32.totalorder %s2816_s12, %s2810_s6 }
  0x8e   : > { %2467 = vmatprep.subr.bf16.mxu0 %v2658_v2  ;;  %2545 = vmatprep.subr.bf16.mxu1 %v2658_v2  ;;  %v2675_v19 = vld [vmem:[%s3157_s26 + $0xa8] sm:$0xff]   ;;  %v2677_v21 = vld [vmem:[%s3157_s26 + $0xb0] sm:$0xff]   ;;  %v2678_v22 = vld [vmem:[%s3157_s26 + $0x38] sm:$0xff]   ;;  %p2813_p3 = pneg %p2812_p6 }
  0x8f   : > { %v2679_v23 = vld [vmem:[%s3157_s26 + $0xb8] sm:$0xff]   ;;  %v2680_v24 = vld [vmem:[%s3157_s26 + $0x40] sm:$0xff]   ;;  %v2682_v26 = vld [vmem:[%s3157_s26 + $0x48] sm:$0xff]   ;;  %p2819_p9 = por %p2818_p7, %p2817_p5 }
  0x90   : > { %v2681_v25 = vld [vmem:[%s3157_s26 + $0xc0] sm:$0xff]   ;;  %v2683_v27 = vld [vmem:[%s3157_s26 + $0xc8] sm:$0xff]   ;;  %v2684_v28 = vld [vmem:[%s3157_s26 + $0x50] sm:$0xff]  }
  0x91   : > { %2468 = vmatpush3.bf16.msra.mxu0 %v2658_v2  ;;  %2553 = vmatpush3.bf16.msra.mxu1 %v2658_v2  ;;  %v2685_v29 = vld [vmem:[%s3157_s26 + $0xd0] sm:$0xff]   ;;  %v2686_v30 = vld [vmem:[%s3157_s26 + $0x58] sm:$0xff]   ;;  %v2688_v32 = vld [vmem:[%s3157_s26 + $0x60] sm:$0xff]   ;;  %p2820_p13 = pnand %p2819_p9, %p2813_p3 }
  0x92   : > { %2469 = vmatprep.subr.bf16.mxu0 %v2659_v3  ;;  %2546 = vmatprep.subr.bf16.mxu1 %v2659_v3  ;;  %v2687_v31 = vld [vmem:[%s3157_s26 + $0xd8] sm:$0xff]   ;;  %v2689_v33 = vld [vmem:[%s3157_s26 + $0xe0] sm:$0xff]   ;;  %v2690_v34 = vld [vmem:[%s3157_s26 + $0x68] sm:$0xff]  }
  0x93   : > { %v2691_v35 = vld [vmem:[%s3157_s26 + $0xe8] sm:$0xff]   ;;  %v2692_v36 = vld [vmem:[%s3157_s26 + $0x70] sm:$0xff]   ;;  %v2694_v38 = vld [vmem:[%s3157_s26 + $0x78] sm:$0xff]  }
  0x94   : > { %v2693_v37 = vld [vmem:[%s3157_s26 + $0xf0] sm:$0xff]   ;;  %v2695_v39 = vld [vmem:[%s3157_s26 + $0xf8] sm:$0xff]   ;;  %v3203_v40 = vld [vmem:[#allocation8] ss:$0 sm:$0xff] }
  0x95   : > { %2470 = vmatpush3.bf16.msra.mxu0 %v2659_v3  ;;  %2554 = vmatpush3.bf16.msra.mxu1 %v2659_v3  ;;  %v3205_v42 = vld [vmem:[#allocation9] ss:$0 sm:$0xff] }
  0x96   : > { %2471 = vmatprep.subr.bf16.mxu0 %v2660_v6  ;;  %2547 = vmatprep.subr.bf16.mxu1 %v2660_v6 }
  0x99   : > { %2472 = vmatpush3.bf16.msra.mxu0 %v2660_v6  ;;  %2555 = vmatpush3.bf16.msra.mxu1 %v2660_v6 }
  0x9a   : > { %2473 = vmatprep.subr.bf16.mxu0 %v2661_v7  ;;  %2548 = vmatprep.subr.bf16.mxu1 %v2661_v7 }
  0x9d   : > { %2474 = vmatpush3.bf16.msra.mxu0 %v2661_v7  ;;  %2556 = vmatpush3.bf16.msra.mxu1 %v2661_v7 }
  0x9e   : > { %2475 = vmatprep.subr.bf16.mxu0 %v2662_v8  ;;  %2549 = vmatprep.subr.bf16.mxu1 %v2662_v8 }
  0xa1   : > { %2476 = vmatpush3.bf16.msra.mxu0 %v2662_v8  ;;  %2557 = vmatpush3.bf16.msra.mxu1 %v2662_v8 }
  0xa2   : > { %2477 = vmatprep.subr.bf16.mxu0 %v2663_v9  ;;  %2550 = vmatprep.subr.bf16.mxu1 %v2663_v9 }
  0xa5   : > { %2478 = vmatpush3.bf16.msra.mxu0 %v2663_v9  ;;  %2558 = vmatpush3.bf16.msra.mxu1 %v2663_v9 }
  0xa8   : > { %2480 = vmatmul.mubr.bf16.vlgmr.msra.gmra.mrb[0].mxu0 %v2666_v10  ;;  %2512 = vmatmul.mubr.bf16.vlgmr.msra.gmra.mrb[0].mxu1 %v2667_v11 }
  0xa9   : > { %2483 = vmatprep.mubr.bf16.mxu0 %v2668_v12  ;;  %2515 = vmatprep.mubr.bf16.mxu1 %v2669_v13 }
  0xb0   : > { %2484 = vmatmul.mubr.bf16.gmra.mrb[4].mxu0 %v2670_v14  ;;  %2516 = vmatmul.mubr.bf16.gmra.mrb[4].mxu1 %v2671_v15 }
  0xb1   : > { %2487 = vmatprep.mubr.bf16.mxu0 %v2672_v16  ;;  %2519 = vmatprep.mubr.bf16.mxu1 %v2673_v17 }
  0xb8   : > { %2488 = vmatmul.mubr.bf16.gmra.mrb[8].mxu0 %v2674_v18  ;;  %2520 = vmatmul.mubr.bf16.gmra.mrb[8].mxu1 %v2675_v19 }
  0xb9   : > { %2491 = vmatprep.mubr.bf16.mxu0 %v2676_v20  ;;  %2523 = vmatprep.mubr.bf16.mxu1 %v2677_v21 }
  0xc0   : > { %2492 = vmatmul.mubr.bf16.gmra.mrb[12].mxu0 %v2678_v22  ;;  %2524 = vmatmul.mubr.bf16.gmra.mrb[12].mxu1 %v2679_v23 }
  0xc1   : > { %2495 = vmatprep.mubr.bf16.mxu0 %v2680_v24  ;;  %2527 = vmatprep.mubr.bf16.mxu1 %v2681_v25 }
  0xc8   : > { %2496 = vmatmul.mubr.bf16.gmra.mrb[16].mxu0 %v2682_v26  ;;  %2528 = vmatmul.mubr.bf16.gmra.mrb[16].mxu1 %v2683_v27 }
  0xc9   : > { %2499 = vmatprep.mubr.bf16.mxu0 %v2684_v28  ;;  %2531 = vmatprep.mubr.bf16.mxu1 %v2685_v29 }
  0xd0   : > { %2500 = vmatmul.mubr.bf16.gmra.mrb[20].mxu0 %v2686_v30  ;;  %2532 = vmatmul.mubr.bf16.gmra.mrb[20].mxu1 %v2687_v31 }
  0xd1   : > { %2503 = vmatprep.mubr.bf16.mxu0 %v2688_v32  ;;  %2535 = vmatprep.mubr.bf16.mxu1 %v2689_v33 }
  0xd8   : > { %2504 = vmatmul.mubr.bf16.gmra.mrb[24].mxu0 %v2690_v34  ;;  %2536 = vmatmul.mubr.bf16.gmra.mrb[24].mxu1 %v2691_v35 }
  0xd9   : > { %2507 = vmatprep.mubr.bf16.mxu0 %v2692_v36  ;;  %2539 = vmatprep.mubr.bf16.mxu1 %v2693_v37 }
  0xe0   : > { %2508 = vmatmul.mubr.bf16.gmra.mrb[28].mxu0 %v2694_v38  ;;  %2540 = vmatmul.mubr.bf16.gmra.mrb[28].mxu1 %v2695_v39 }
 0x17b   : > { %v2481_v41 = vpop.f32.mrb[0].mxu0  ;;  %v2513_v43 = vpop.f32.mrb[0].mxu1 }
 0x17c   : > { %v1254_v44 = vmul.f32 %v2481_v41, %v3203_v40  ;;  %v1286_v45 = vmul.f32 %v2513_v43, %v3203_v40  ;;  %v795_v46 = vpop.f32.mrb[1].mxu0  ;;  %v923_v47 = vpop.f32.mrb[1].mxu1 }
 0x17d   : > { %v1252_v48 = vmul.f32 %v3203_v40, %v795_v46  ;;  %v1284_v49 = vmul.f32 %v3203_v40, %v923_v47  ;;  %v2482_v50 = vpop.f32.mrb[2].mxu0  ;;  %v2514_v51 = vpop.f32.mrb[2].mxu1 }
 0x17e   : > { %v1325_v52 = vadd.f32 %v3205_v42, %v1254_v44  ;;  %v1357_v53 = vadd.f32 %v3205_v42, %v1286_v45  ;;  %v1255_v54 = vmul.f32 %v2482_v50, %v3203_v40  ;;  %v1287_v55 = vmul.f32 %v2514_v51, %v3203_v40  ;;  %v798_v56 = vpop.f32.mrb[3].mxu0  ;;  %v926_v57 = vpop.f32.mrb[3].mxu1 }
 0x17f   : > { %v1323_v58 = vadd.f32 %v3205_v42, %v1252_v48  ;;  %v1355_v59 = vadd.f32 %v3205_v42, %v1284_v49  ;;  %v1253_v60 = vmul.f32 %v3203_v40, %v798_v56  ;;  %v1285_v61 = vmul.f32 %v3203_v40, %v926_v57 }
 0x180   : > { %vm1389_vm0 = vcmp.ge.f32.partialorder %v1325_v52, 0.0  ;;  %v1453_v62 = vmul.f32 0.2, %v1325_v52  ;;  %vm1421_vm1 = vcmp.ge.f32.partialorder %v1357_v53, 0.0  ;;  %v1485_v63 = vmul.f32 0.2, %v1357_v53 }
 0x181   : > { %vm1387_vm2 = vcmp.ge.f32.partialorder %v1323_v58, 0.0  ;;  %v1451_v0 = vmul.f32 0.2, %v1323_v58  ;;  %vm1419_vm3 = vcmp.ge.f32.partialorder %v1355_v59, 0.0  ;;  %v1483_v1 = vmul.f32 0.2, %v1355_v59 }
 0x182   : > { %v1517_v2 = vsel %vm1389_vm0, %v1325_v52, %v1453_v62  ;;  %v1549_v3 = vsel %vm1421_vm1, %v1357_v53, %v1485_v63  ;;  %v1326_v4 = vadd.f32 %v3205_v42, %v1255_v54  ;;  %v1358_v5 = vadd.f32 %v3205_v42, %v1287_v55 }
 0x183   : > { %v1515_v6 = vsel %vm1387_vm2, %v1323_v58, %v1451_v0  ;;  %v1547_v7 = vsel %vm1419_vm3, %v1355_v59, %v1483_v1  ;;  %v1324_v8 = vadd.f32 %v3205_v42, %v1253_v60  ;;  %v1356_v9 = vadd.f32 %v3205_v42, %v1285_v61  ;;  %v2485_v10 = vpop.f32.mrb[4].mxu0  ;;  %v2517_v11 = vpop.f32.mrb[4].mxu1 }
 0x184   : > { %vm1390_vm4 = vcmp.ge.f32.partialorder %v1326_v4, 0.0  ;;  %v1454_v12 = vmul.f32 0.2, %v1326_v4  ;;  %vm1422_vm5 = vcmp.ge.f32.partialorder %v1358_v5, 0.0  ;;  %v1486_v13 = vmul.f32 0.2, %v1358_v5 }
 0x185   : > { %vm1388_vm6 = vcmp.ge.f32.partialorder %v1324_v8, 0.0  ;;  %v1452_v14 = vmul.f32 0.2, %v1324_v8  ;;  %vm1420_vm7 = vcmp.ge.f32.partialorder %v1356_v9, 0.0  ;;  %v1484_v15 = vmul.f32 0.2, %v1356_v9 }
 0x186   : > { %v1518_v16 = vsel %vm1390_vm4, %v1326_v4, %v1454_v12  ;;  %v1550_v17 = vsel %vm1422_vm5, %v1358_v5, %v1486_v13  ;;  %v1258_v18 = vmul.f32 %v2485_v10, %v3203_v40  ;;  %v1290_v19 = vmul.f32 %v2517_v11, %v3203_v40  ;;  %v811_v20 = vpop.f32.mrb[5].mxu0  ;;  %v939_v21 = vpop.f32.mrb[5].mxu1 }
 0x187   : > { %v2240_v22 = vpack.c.bf16 %v1518_v16, %v1517_v2  ;;  %v2320_v23 = vpack.c.bf16 %v1550_v17, %v1549_v3  ;;  %v1516_v24 = vsel %vm1388_vm6, %v1324_v8, %v1452_v14  ;;  %v1548_v25 = vsel %vm1420_vm7, %v1356_v9, %v1484_v15  ;;  %v2486_v26 = vpop.f32.mrb[6].mxu0  ;;  %v2518_v27 = vpop.f32.mrb[6].mxu1 }
 0x188   : > { %v2235_v28 = vpack.c.bf16 %v1516_v24, %v1515_v6  ;;  %v2315_v29 = vpack.c.bf16 %v1548_v25, %v1547_v7  ;;  %v1329_v30 = vadd.f32 %v3205_v42, %v1258_v18  ;;  %v1361_v31 = vadd.f32 %v3205_v42, %v1290_v19  ;;  %v814_v32 = vpop.f32.mrb[7].mxu0  ;;  %v942_v33 = vpop.f32.mrb[7].mxu1 }
 0x189   : > { %2392 = vst [vmem:[%s3229_s23 + $0x8] sm:$0xff] %v2240_v22   ;;  %2408 = vst [vmem:[%s3229_s23 + $0x88] sm:$0xff] %v2320_v23   ;;  %v1256_v34 = vmul.f32 %v3203_v40, %v811_v20  ;;  %v1288_v35 = vmul.f32 %v3203_v40, %v939_v21  ;;  %v1259_v36 = vmul.f32 %v2486_v26, %v3203_v40 }
 0x18a   : > { %v1291_v37 = vmul.f32 %v2518_v27, %v3203_v40  ;;  %2236 = vst [vmem:[%s3229_s23] sm:$0xff] %v2235_v28   ;;  %2407 = vst [vmem:[%s3229_s23 + $0x80] sm:$0xff] %v2315_v29   ;;  %vm1393_vm8 = vcmp.ge.f32.partialorder %v1329_v30, 0.0  ;;  %v1457_v38 = vmul.f32 0.2, %v1329_v30  ;;  %vm1425_vm9 = vcmp.ge.f32.partialorder %v1361_v31, 0.0 }
 0x18b   : > { %v1489_v39 = vmul.f32 0.2, %v1361_v31  ;;  %v1327_v41 = vadd.f32 %v3205_v42, %v1256_v34  ;;  %v1359_v43 = vadd.f32 %v3205_v42, %v1288_v35  ;;  %v1330_v44 = vadd.f32 %v3205_v42, %v1259_v36  ;;  %v2489_v46 = vpop.f32.mrb[8].mxu0  ;;  %v2521_v47 = vpop.f32.mrb[8].mxu1 }
 0x18c   : > { %v1362_v45 = vadd.f32 %v3205_v42, %v1291_v37  ;;  %v1521_v48 = vsel %vm1393_vm8, %v1329_v30, %v1457_v38  ;;  %v1257_v50 = vmul.f32 %v3203_v40, %v814_v32  ;;  %v1289_v51 = vmul.f32 %v3203_v40, %v942_v33  ;;  %v827_v52 = vpop.f32.mrb[9].mxu0  ;;  %v955_v53 = vpop.f32.mrb[9].mxu1 }
 0x18d   : > { %v1553_v49 = vsel %vm1425_vm9, %v1361_v31, %v1489_v39  ;;  %vm1391_vm10 = vcmp.ge.f32.partialorder %v1327_v41, 0.0  ;;  %v1455_v54 = vmul.f32 0.2, %v1327_v41  ;;  %vm1423_vm11 = vcmp.ge.f32.partialorder %v1359_v43, 0.0  ;;  %v2490_v62 = vpop.f32.mrb[10].mxu0  ;;  %v2522_v63 = vpop.f32.mrb[10].mxu1 }
 0x18e   : > { %v1487_v55 = vmul.f32 0.2, %v1359_v43  ;;  %vm1394_vm12 = vcmp.ge.f32.partialorder %v1330_v44, 0.0  ;;  %v1458_v56 = vmul.f32 0.2, %v1330_v44  ;;  %vm1426_vm13 = vcmp.ge.f32.partialorder %v1362_v45, 0.0 }
 0x18f   : > { %v1490_v57 = vmul.f32 0.2, %v1362_v45  ;;  %v1519_v58 = vsel %vm1391_vm10, %v1327_v41, %v1455_v54  ;;  %v1328_v60 = vadd.f32 %v3205_v42, %v1257_v50  ;;  %v1360_v61 = vadd.f32 %v3205_v42, %v1289_v51  ;;  %v830_v4 = vpop.f32.mrb[11].mxu0  ;;  %v958_v5 = vpop.f32.mrb[11].mxu1 }
 0x190   : > { %v1551_v59 = vsel %vm1423_vm11, %v1359_v43, %v1487_v55  ;;  %v1522_v0 = vsel %vm1394_vm12, %v1330_v44, %v1458_v56  ;;  %v1262_v2 = vmul.f32 %v2489_v46, %v3203_v40  ;;  %v1294_v3 = vmul.f32 %v2521_v47, %v3203_v40 }
 0x191   : > { %v1554_v1 = vsel %vm1426_vm13, %v1362_v45, %v1490_v57  ;;  %v2250_v6 = vpack.c.bf16 %v1522_v0, %v1521_v48  ;;  %vm1392_vm14 = vcmp.ge.f32.partialorder %v1328_v60, 0.0  ;;  %v1456_v8 = vmul.f32 0.2, %v1328_v60 }
 0x192   : > { %v2330_v7 = vpack.c.bf16 %v1554_v1, %v1553_v49  ;;  %vm1424_vm15 = vcmp.ge.f32.partialorder %v1360_v61, 0.0  ;;  %v1488_v9 = vmul.f32 0.2, %v1360_v61  ;;  %v1333_v10 = vadd.f32 %v3205_v42, %v1262_v2 }
 0x193   : > { %v1365_v11 = vadd.f32 %v3205_v42, %v1294_v3  ;;  %2394 = vst [vmem:[%s3229_s23 + $0x18] sm:$0xff] %v2250_v6   ;;  %v1520_v12 = vsel %vm1392_vm14, %v1328_v60, %v1456_v8  ;;  %v1260_v13 = vmul.f32 %v3203_v40, %v827_v52  ;;  %v1292_v14 = vmul.f32 %v3203_v40, %v955_v53  ;;  %v2493_v16 = vpop.f32.mrb[12].mxu0  ;;  %v2525_v17 = vpop.f32.mrb[12].mxu1 }
 0x194   : > { %2410 = vst [vmem:[%s3229_s23 + $0x98] sm:$0xff] %v2330_v7   ;;  %v1263_v15 = vmul.f32 %v2490_v62, %v3203_v40  ;;  %v2245_v18 = vpack.c.bf16 %v1520_v12, %v1519_v58  ;;  %v1552_v19 = vsel %vm1424_vm15, %v1360_v61, %v1488_v9  ;;  %vm1397_vm0 = vcmp.ge.f32.partialorder %v1333_v10, 0.0  ;;  %v843_v21 = vpop.f32.mrb[13].mxu0  ;;  %v971_v22 = vpop.f32.mrb[13].mxu1 }
 0x195   : > { %v1461_v20 = vmul.f32 0.2, %v1333_v10  ;;  %v2325_v23 = vpack.c.bf16 %v1552_v19, %v1551_v59  ;;  %vm1429_vm1 = vcmp.ge.f32.partialorder %v1365_v11, 0.0  ;;  %v1493_v24 = vmul.f32 0.2, %v1365_v11  ;;  %v2494_v26 = vpop.f32.mrb[14].mxu0 }
 0x196   : > { %v1331_v25 = vadd.f32 %v3205_v42, %v1260_v13  ;;  %v3257_v27 = vpop.f32.mrb[14].mxu1  ;;  %2393 = vst [vmem:[%s3229_s23 + $0x10] sm:$0xff] %v2245_v18   ;;  %v1363_v29 = vadd.f32 %v3205_v42, %v1292_v14  ;;  %v1334_v30 = vadd.f32 %v3205_v42, %v1263_v15  ;;  %v1295_v31 = vmul.f32 %v2522_v63, %v3203_v40  ;;  %v3263_v32 = vpop.f32.mrb[15].mxu0 }
 0x197   : > { %v1525_v28 = vsel %vm1397_vm0, %v1333_v10, %v1461_v20  ;;  %v3265_v33 = vpop.f32.mrb[15].mxu1  ;;  %2409 = vst [vmem:[%s3229_s23 + $0x90] sm:$0xff] %v2325_v23   ;;  %v1557_v34 = vsel %vm1429_vm1, %v1365_v11, %v1493_v24  ;;  %v1261_v36 = vmul.f32 %v3203_v40, %v830_v4  ;;  %v1293_v44 = vmul.f32 %v3203_v40, %v958_v5 }
 0x198   : > { %vm1395_vm2 = vcmp.ge.f32.partialorder %v1331_v25, 0.0  ;;  %v1459_v35 = vmul.f32 0.2, %v1331_v25  ;;  %vm1427_vm3 = vcmp.ge.f32.partialorder %v1363_v29, 0.0  ;;  %v1491_v37 = vmul.f32 0.2, %v1363_v29 }
 0x199   : > { %vm1398_vm4 = vcmp.ge.f32.partialorder %v1334_v30, 0.0  ;;  %v1462_v38 = vmul.f32 0.2, %v1334_v30  ;;  %v1366_v41 = vadd.f32 %v3205_v42, %v1295_v31  ;;  %v1332_v43 = vadd.f32 %v3205_v42, %v1261_v36 }
 0x19a   : > { %v1523_v39 = vsel %vm1395_vm2, %v1331_v25, %v1459_v35  ;;  %v1555_v45 = vsel %vm1427_vm3, %v1363_v29, %v1491_v37  ;;  %v1266_v47 = vmul.f32 %v2493_v16, %v3203_v40  ;;  %v1298_v48 = vmul.f32 %v2525_v17, %v3203_v40 }
 0x19b   : > { %v1526_v46 = vsel %vm1398_vm4, %v1334_v30, %v1462_v38  ;;  %vm1430_vm5 = vcmp.ge.f32.partialorder %v1366_v41, 0.0  ;;  %v1494_v50 = vmul.f32 0.2, %v1366_v41  ;;  %vm1396_vm6 = vcmp.ge.f32.partialorder %v1332_v43, 0.0  ;;  %v2497_v51 = vpop.f32.mrb[16].mxu0  ;;  %v3274_v52 = vpop.f32.mrb[16].mxu1 }
 0x19c   : > { %v2260_v49 = vpack.c.bf16 %v1526_v46, %v1525_v28  ;;  %v1460_v53 = vmul.f32 0.2, %v1332_v43  ;;  %v1364_v54 = vadd.f32 %v3205_v42, %v1293_v44  ;;  %v1337_v55 = vadd.f32 %v3205_v42, %v1266_v47  ;;  %v859_v57 = vpop.f32.mrb[17].mxu0  ;;  %v987_v58 = vpop.f32.mrb[17].mxu1 }
 0x19d   : > { %v1369_v56 = vadd.f32 %v3205_v42, %v1298_v48  ;;  %v1558_v59 = vsel %vm1430_vm5, %v1366_v41, %v1494_v50  ;;  %v1264_v60 = vmul.f32 %v3203_v40, %v843_v21  ;;  %v1296_v61 = vmul.f32 %v3203_v40, %v971_v22  ;;  %v3283_v63 = vpop.f32.mrb[18].mxu0  ;;  %v3285_v0 = vpop.f32.mrb[18].mxu1 }
 0x19e   : > { %2396 = vst [vmem:[%s3229_s23 + $0x28] sm:$0xff] %v2260_v49   ;;  %v1267_v62 = vmul.f32 %v2494_v26, %v3203_v40  ;;  %v2340_v1 = vpack.c.bf16 %v1558_v59, %v1557_v34  ;;  %v1524_v2 = vsel %vm1396_vm6, %v1332_v43, %v1460_v53  ;;  %vm1428_vm7 = vcmp.ge.f32.partialorder %v1364_v54, 0.0  ;;  %v3288_v4 = vpop.f32.mrb[19].mxu0  ;;  %v3290_v5 = vpop.f32.mrb[19].mxu1 }
 0x19f   : > { %v1492_v3 = vmul.f32 0.2, %v1364_v54  ;;  %v2255_v6 = vpack.c.bf16 %v1524_v2, %v1523_v39  ;;  %vm1401_vm8 = vcmp.ge.f32.partialorder %v1337_v55, 0.0  ;;  %v1465_v7 = vmul.f32 0.2, %v1337_v55 }
 0x1a0   : > { %vm1433_vm9 = vcmp.ge.f32.partialorder %v1369_v56, 0.0  ;;  %2412 = vst [vmem:[%s3229_s23 + $0xa8] sm:$0xff] %v2340_v1   ;;  %v1497_v9 = vmul.f32 0.2, %v1369_v56  ;;  %v1335_v10 = vadd.f32 %v3205_v42, %v1264_v60  ;;  %v1367_v11 = vadd.f32 %v3205_v42, %v1296_v61 }
 0x1a1   : > { %v1556_v8 = vsel %vm1428_vm7, %v1364_v54, %v1492_v3  ;;  %2395 = vst [vmem:[%s3229_s23 + $0x20] sm:$0xff] %v2255_v6   ;;  %v1529_v13 = vsel %vm1401_vm8, %v1337_v55, %v1465_v7  ;;  %v1338_v14 = vadd.f32 %v3205_v42, %v1267_v62  ;;  %v1299_v15 = vmul.f32 %v3257_v27, %v3203_v40 }
 0x1a2   : > { %v2335_v12 = vpack.c.bf16 %v1556_v8, %v1555_v45  ;;  %v1561_v16 = vsel %vm1433_vm9, %v1369_v56, %v1497_v9  ;;  %vm1399_vm10 = vcmp.ge.f32.partialorder %v1335_v10, 0.0  ;;  %v1463_v17 = vmul.f32 0.2, %v1335_v10 }
 0x1a3   : > { %vm1431_vm11 = vcmp.ge.f32.partialorder %v1367_v11, 0.0  ;;  %v1495_v18 = vmul.f32 0.2, %v1367_v11  ;;  %vm1402_vm12 = vcmp.ge.f32.partialorder %v1338_v14, 0.0  ;;  %v1466_v19 = vmul.f32 0.2, %v1338_v14 }
 0x1a4   : > { %2411 = vst [vmem:[%s3229_s23 + $0xa0] sm:$0xff] %v2335_v12   ;;  %v1370_v20 = vadd.f32 %v3205_v42, %v1299_v15  ;;  %v3301_v21 = vpop.f32.mrb[20].mxu0  ;;  %v1527_v22 = vsel %vm1399_vm10, %v1335_v10, %v1463_v17  ;;  %v1265_v23 = vmul.f32 %v3203_v40, %v3263_v32  ;;  %v1297_v24 = vmul.f32 %v3203_v40, %v3265_v33  ;;  %v3308_v26 = vpop.f32.mrb[20].mxu1 }
 0x1a5   : > { %v1270_v25 = vmul.f32 %v2497_v51, %v3203_v40  ;;  %v3310_v27 = vpop.f32.mrb[21].mxu0  ;;  %v1559_v28 = vsel %vm1431_vm11, %v1367_v11, %v1495_v18  ;;  %v1530_v29 = vsel %vm1402_vm12, %v1338_v14, %v1466_v19  ;;  %v3312_v31 = vpop.f32.mrb[21].mxu1  ;;  %v1302_v41 = vmul.f32 %v3274_v52, %v3203_v40 }
 0x1a6   : > { %vm1434_vm13 = vcmp.ge.f32.partialorder %v1370_v20, 0.0  ;;  %v1498_v30 = vmul.f32 0.2, %v1370_v20  ;;  %v3314_v34 = vpop.f32.mrb[22].mxu0  ;;  %v2270_v35 = vpack.c.bf16 %v1530_v29, %v1529_v13  ;;  %v1336_v32 = vadd.f32 %v3205_v42, %v1265_v23  ;;  %v3319_v37 = vpop.f32.mrb[22].mxu1 }
 0x1a7   : > { %v1368_v33 = vadd.f32 %v3205_v42, %v1297_v24  ;;  %v1341_v36 = vadd.f32 %v3205_v42, %v1270_v25  ;;  %v3321_v38 = vpop.f32.mrb[23].mxu0  ;;  %v1268_v43 = vmul.f32 %v3203_v40, %v859_v57  ;;  %v1300_v44 = vmul.f32 %v3203_v40, %v987_v58  ;;  %v3327_v45 = vpop.f32.mrb[23].mxu1 }
 0x1a8   : > { %v1562_v39 = vsel %vm1434_vm13, %v1370_v20, %v1498_v30  ;;  %2398 = vst [vmem:[%s3229_s23 + $0x38] sm:$0xff] %v2270_v35   ;;  %vm1400_vm14 = vcmp.ge.f32.partialorder %v1336_v32, 0.0  ;;  %v1464_v47 = vmul.f32 0.2, %v1336_v32  ;;  %v1373_v50 = vadd.f32 %v3205_v42, %v1302_v41 }
 0x1a9   : > { %v2350_v46 = vpack.c.bf16 %v1562_v39, %v1561_v16  ;;  %vm1432_vm15 = vcmp.ge.f32.partialorder %v1368_v33, 0.0  ;;  %v1496_v48 = vmul.f32 0.2, %v1368_v33  ;;  %vm1405_vm0 = vcmp.ge.f32.partialorder %v1341_v36, 0.0 }
 0x1aa   : > { %v1469_v49 = vmul.f32 0.2, %v1341_v36  ;;  %v1528_v51 = vsel %vm1400_vm14, %v1336_v32, %v1464_v47  ;;  %v1339_v52 = vadd.f32 %v3205_v42, %v1268_v43  ;;  %v1371_v53 = vadd.f32 %v3205_v42, %v1300_v44 }
 0x1ab   : > { %2414 = vst [vmem:[%s3229_s23 + $0xb8] sm:$0xff] %v2350_v46   ;;  %v1271_v54 = vmul.f32 %v3283_v63, %v3203_v40  ;;  %v2265_v55 = vpack.c.bf16 %v1528_v51, %v1527_v22  ;;  %v1560_v56 = vsel %vm1432_vm15, %v1368_v33, %v1496_v48  ;;  %vm1437_vm1 = vcmp.ge.f32.partialorder %v1373_v50, 0.0  ;;  %v3336_v58 = vpop.f32.mrb[24].mxu0  ;;  %v3338_v59 = vpop.f32.mrb[24].mxu1 }
 0x1ac   : > { %v1533_v57 = vsel %vm1405_vm0, %v1341_v36, %v1469_v49  ;;  %v2345_v60 = vpack.c.bf16 %v1560_v56, %v1559_v28  ;;  %v1501_v61 = vmul.f32 0.2, %v1373_v50  ;;  %vm1403_vm2 = vcmp.ge.f32.partialorder %v1339_v52, 0.0  ;;  %v3340_v1 = vpop.f32.mrb[25].mxu0  ;;  %v3346_v6 = vpop.f32.mrb[25].mxu1 }
 0x1ad   : > { %v1467_v62 = vmul.f32 0.2, %v1339_v52  ;;  %2397 = vst [vmem:[%s3229_s23 + $0x30] sm:$0xff] %v2265_v55   ;;  %vm1435_vm3 = vcmp.ge.f32.partialorder %v1371_v53, 0.0  ;;  %v1499_v2 = vmul.f32 0.2, %v1371_v53  ;;  %v1342_v63 = vadd.f32 %v3205_v42, %v1271_v54 }
 0x1ae   : > { %v1303_v3 = vmul.f32 %v3285_v0, %v3203_v40  ;;  %v3348_v7 = vpop.f32.mrb[26].mxu0  ;;  %2413 = vst [vmem:[%s3229_s23 + $0xb0] sm:$0xff] %v2345_v60   ;;  %v1565_v8 = vsel %vm1437_vm1, %v1373_v50, %v1501_v61  ;;  %v1269_v10 = vmul.f32 %v3203_v40, %v3288_v4  ;;  %v1301_v11 = vmul.f32 %v3203_v40, %v3290_v5  ;;  %v3356_v12 = vpop.f32.mrb[26].mxu1 }
 0x1af   : > { %v1531_v9 = vsel %vm1403_vm2, %v1339_v52, %v1467_v62  ;;  %v3358_v13 = vpop.f32.mrb[27].mxu0  ;;  %v1563_v14 = vsel %vm1435_vm3, %v1371_v53, %v1499_v2  ;;  %vm1406_vm4 = vcmp.ge.f32.partialorder %v1342_v63, 0.0  ;;  %v1470_v0 = vmul.f32 0.2, %v1342_v63  ;;  %v3361_v16 = vpop.f32.mrb[27].mxu1 }
 0x1b0   : > { %v1374_v15 = vadd.f32 %v3205_v42, %v1303_v3  ;;  %v1340_v17 = vadd.f32 %v3205_v42, %v1269_v10  ;;  %v1372_v18 = vadd.f32 %v3205_v42, %v1301_v11  ;;  %v1274_v4 = vmul.f32 %v3301_v21, %v3203_v40 }
 0x1b1   : > { %v1306_v5 = vmul.f32 %v3308_v26, %v3203_v40  ;;  %v1534_v19 = vsel %vm1406_vm4, %v1342_v63, %v1470_v0  ;;  %v1272_v22 = vmul.f32 %v3203_v40, %v3310_v27  ;;  %v1304_v33 = vmul.f32 %v3203_v40, %v3312_v31 }
 0x1b2   : > { %vm1438_vm5 = vcmp.ge.f32.partialorder %v1374_v15, 0.0  ;;  %v1502_v20 = vmul.f32 0.2, %v1374_v15  ;;  %v2280_v23 = vpack.c.bf16 %v1534_v19, %v1533_v57  ;;  %vm1404_vm6 = vcmp.ge.f32.partialorder %v1340_v17, 0.0 }
 0x1b3   : > { %v1468_v24 = vmul.f32 0.2, %v1340_v17  ;;  %vm1436_vm7 = vcmp.ge.f32.partialorder %v1372_v18, 0.0  ;;  %v1500_v28 = vmul.f32 0.2, %v1372_v18  ;;  %v1345_v29 = vadd.f32 %v3205_v42, %v1274_v4  ;;  %v3373_v30 = vpop.f32.mrb[28].mxu0 }
 0x1b4   : > { %v1566_v25 = vsel %vm1438_vm5, %v1374_v15, %v1502_v20  ;;  %v1377_v21 = vadd.f32 %v3205_v42, %v1306_v5  ;;  %v3375_v26 = vpop.f32.mrb[28].mxu1  ;;  %2400 = vst [vmem:[%s3229_s23 + $0x48] sm:$0xff] %v2280_v23   ;;  %v1343_v27 = vadd.f32 %v3205_v42, %v1272_v22  ;;  %v3381_v36 = vpop.f32.mrb[29].mxu0  ;;  %v1375_v53 = vadd.f32 %v3205_v42, %v1304_v33 }
 0x1b5   : > { %v2360_v35 = vpack.c.bf16 %v1566_v25, %v1565_v8  ;;  %v1532_v32 = vsel %vm1404_vm6, %v1340_v17, %v1468_v24  ;;  %v3383_v39 = vpop.f32.mrb[29].mxu1  ;;  %v1564_v43 = vsel %vm1436_vm7, %v1372_v18, %v1500_v28  ;;  %vm1409_vm8 = vcmp.ge.f32.partialorder %v1345_v29, 0.0  ;;  %v3385_v46 = vpop.f32.mrb[30].mxu0 }
 0x1b6   : > { %v2275_v41 = vpack.c.bf16 %v1532_v32, %v1531_v9  ;;  %v1473_v44 = vmul.f32 0.2, %v1345_v29  ;;  %v3387_v47 = vpop.f32.mrb[30].mxu1  ;;  %v2355_v48 = vpack.c.bf16 %v1564_v43, %v1563_v14  ;;  %vm1441_vm9 = vcmp.ge.f32.partialorder %v1377_v21, 0.0  ;;  %v3390_v31 = vpop.f32.mrb[31].mxu0 }
 0x1b7   : > { %2416 = vst [vmem:[%s3229_s23 + $0xc8] sm:$0xff] %v2360_v35   ;;  %v1505_v49 = vmul.f32 0.2, %v1377_v21  ;;  %vm1407_vm10 = vcmp.ge.f32.partialorder %v1343_v27, 0.0  ;;  %v3392_v50 = vpop.f32.mrb[31].mxu1  ;;  %v1275_v54 = vmul.f32 %v3314_v34, %v3203_v40  ;;  %v1307_v56 = vmul.f32 %v3319_v37, %v3203_v40 }
 0x1b8   : > { %2399 = vst [vmem:[%s3229_s23 + $0x40] sm:$0xff] %v2275_v41   ;;  %v1537_v51 = vsel %vm1409_vm8, %v1345_v29, %v1473_v44  ;;  %v1471_v52 = vmul.f32 0.2, %v1343_v27  ;;  %2415 = vst [vmem:[%s3229_s23 + $0xc0] sm:$0xff] %v2355_v48   ;;  %v1273_v57 = vmul.f32 %v3203_v40, %v3321_v38  ;;  %v1305_v60 = vmul.f32 %v3203_v40, %v3327_v45 }
 0x1b9   : > { %v1569_v55 = vsel %vm1441_vm9, %v1377_v21, %v1505_v49  ;;  %vm1439_vm11 = vcmp.ge.f32.partialorder %v1375_v53, 0.0  ;;  %v1503_v62 = vmul.f32 0.2, %v1375_v53  ;;  %v1346_v2 = vadd.f32 %v3205_v42, %v1275_v54 }
 0x1ba   : > { %v1535_v61 = vsel %vm1407_vm10, %v1343_v27, %v1471_v52  ;;  %v1378_v63 = vadd.f32 %v3205_v42, %v1307_v56  ;;  %v1344_v34 = vadd.f32 %v3205_v42, %v1273_v57  ;;  %v1376_v3 = vadd.f32 %v3205_v42, %v1305_v60 }
 0x1bb   : > { %v1278_v37 = vmul.f32 %v3336_v58, %v3203_v40  ;;  %v1567_v8 = vsel %vm1439_vm11, %v1375_v53, %v1503_v62  ;;  %vm1410_vm12 = vcmp.ge.f32.partialorder %v1346_v2, 0.0  ;;  %v1474_v38 = vmul.f32 0.2, %v1346_v2 }
 0x1bc   : > { %v1310_v45 = vmul.f32 %v3338_v59, %v3203_v40  ;;  %vm1442_vm13 = vcmp.ge.f32.partialorder %v1378_v63, 0.0  ;;  %v1506_v9 = vmul.f32 0.2, %v1378_v63  ;;  %vm1408_vm14 = vcmp.ge.f32.partialorder %v1344_v34, 0.0 }
 0x1bd   : > { %v1472_v10 = vmul.f32 0.2, %v1344_v34  ;;  %v1538_v11 = vsel %vm1410_vm12, %v1346_v2, %v1474_v38  ;;  %vm1440_vm15 = vcmp.ge.f32.partialorder %v1376_v3, 0.0  ;;  %v1504_v14 = vmul.f32 0.2, %v1376_v3 }
 0x1be   : > { %v1349_v0 = vadd.f32 %v3205_v42, %v1278_v37  ;;  %v2290_v15 = vpack.c.bf16 %v1538_v11, %v1537_v51  ;;  %v1570_v58 = vsel %vm1442_vm13, %v1378_v63, %v1506_v9  ;;  %v1381_v18 = vadd.f32 %v3205_v42, %v1310_v45 }
 0x1bf   : > { %v1536_v17 = vsel %vm1408_vm14, %v1344_v34, %v1472_v10  ;;  %v2370_v4 = vpack.c.bf16 %v1570_v58, %v1569_v55  ;;  %v1568_v5 = vsel %vm1440_vm15, %v1376_v3, %v1504_v14  ;;  %v1276_v23 = vmul.f32 %v3203_v40, %v3340_v1 }
 0x1c0   : > { %v2285_v59 = vpack.c.bf16 %v1536_v17, %v1535_v61  ;;  %vm1413_vm0 = vcmp.ge.f32.partialorder %v1349_v0, 0.0  ;;  %2402 = vst [vmem:[%s3229_s23 + $0x58] sm:$0xff] %v2290_v15   ;;  %v2365_v19 = vpack.c.bf16 %v1568_v5, %v1567_v8  ;;  %v1477_v20 = vmul.f32 0.2, %v1349_v0 }
 0x1c1   : > { %vm1445_vm1 = vcmp.ge.f32.partialorder %v1381_v18, 0.0  ;;  %v1509_v22 = vmul.f32 0.2, %v1381_v18  ;;  %2418 = vst [vmem:[%s3229_s23 + $0xd8] sm:$0xff] %v2370_v4   ;;  %v1308_v24 = vmul.f32 %v3203_v40, %v3346_v6  ;;  %v1279_v25 = vmul.f32 %v3348_v7, %v3203_v40 }
 0x1c2   : > { %2401 = vst [vmem:[%s3229_s23 + $0x50] sm:$0xff] %v2285_v59   ;;  %v1311_v28 = vmul.f32 %v3356_v12, %v3203_v40  ;;  %2417 = vst [vmem:[%s3229_s23 + $0xd0] sm:$0xff] %v2365_v19   ;;  %v1541_v29 = vsel %vm1413_vm0, %v1349_v0, %v1477_v20  ;;  %v1277_v35 = vmul.f32 %v3203_v40, %v3358_v13 }
 0x1c3   : > { %v1573_v21 = vsel %vm1445_vm1, %v1381_v18, %v1509_v22  ;;  %v1309_v32 = vmul.f32 %v3203_v40, %v3361_v16  ;;  %v1347_v1 = vadd.f32 %v3205_v42, %v1276_v23  ;;  %v1379_v27 = vadd.f32 %v3205_v42, %v1308_v24 }
 0x1c4   : > { %v1350_v6 = vadd.f32 %v3205_v42, %v1279_v25  ;;  %v1382_v7 = vadd.f32 %v3205_v42, %v1311_v28  ;;  %v1348_v33 = vadd.f32 %v3205_v42, %v1277_v35  ;;  %v1282_v41 = vmul.f32 %v3373_v30, %v3203_v40 }
 0x1c5   : > { %v1380_v12 = vadd.f32 %v3205_v42, %v1309_v32  ;;  %v1314_v13 = vmul.f32 %v3375_v26, %v3203_v40  ;;  %vm1411_vm2 = vcmp.ge.f32.partialorder %v1347_v1, 0.0  ;;  %v1475_v16 = vmul.f32 0.2, %v1347_v1 }
 0x1c6   : > { %vm1443_vm3 = vcmp.ge.f32.partialorder %v1379_v27, 0.0  ;;  %v1507_v43 = vmul.f32 0.2, %v1379_v27  ;;  %vm1414_vm4 = vcmp.ge.f32.partialorder %v1350_v6, 0.0  ;;  %v1478_v44 = vmul.f32 0.2, %v1350_v6 }
 0x1c7   : > { %vm1446_vm5 = vcmp.ge.f32.partialorder %v1382_v7, 0.0  ;;  %v1510_v48 = vmul.f32 0.2, %v1382_v7  ;;  %v1539_v49 = vsel %vm1411_vm2, %v1347_v1, %v1475_v16  ;;  %vm1412_vm6 = vcmp.ge.f32.partialorder %v1348_v33, 0.0 }
 0x1c8   : > { %v1571_v51 = vsel %vm1443_vm3, %v1379_v27, %v1507_v43  ;;  %v1476_v52 = vmul.f32 0.2, %v1348_v33  ;;  %v1542_v53 = vsel %vm1414_vm4, %v1350_v6, %v1478_v44  ;;  %vm1444_vm7 = vcmp.ge.f32.partialorder %v1380_v12, 0.0 }
 0x1c9   : > { %v1574_v54 = vsel %vm1446_vm5, %v1382_v7, %v1510_v48  ;;  %v1508_v30 = vmul.f32 0.2, %v1380_v12  ;;  %v2300_v26 = vpack.c.bf16 %v1542_v53, %v1541_v29  ;;  %v1353_v57 = vadd.f32 %v3205_v42, %v1282_v41 }
 0x1ca   : > { %v2380_v55 = vpack.c.bf16 %v1574_v54, %v1573_v21  ;;  %v1540_v56 = vsel %vm1412_vm6, %v1348_v33, %v1476_v52  ;;  %v1385_v62 = vadd.f32 %v3205_v42, %v1314_v13  ;;  %v1280_v2 = vmul.f32 %v3203_v40, %v3381_v36 }
 0x1cb   : > { %v2295_v60 = vpack.c.bf16 %v1540_v56, %v1539_v49  ;;  %v1572_v61 = vsel %vm1444_vm7, %v1380_v12, %v1508_v30  ;;  %2404 = vst [vmem:[%s3229_s23 + $0x68] sm:$0xff] %v2300_v26   ;;  %v1481_v34 = vmul.f32 0.2, %v1353_v57  ;;  %v1312_v3 = vmul.f32 %v3203_v40, %v3383_v39 }
 0x1cc   : > { %2420 = vst [vmem:[%s3229_s23 + $0xe8] sm:$0xff] %v2380_v55   ;;  %v2375_v63 = vpack.c.bf16 %v1572_v61, %v1571_v51  ;;  %vm1417_vm8 = vcmp.ge.f32.partialorder %v1353_v57, 0.0  ;;  %v1351_v37 = vadd.f32 %v3205_v42, %v1280_v2  ;;  %v1283_v8 = vmul.f32 %v3385_v46, %v3203_v40 }
 0x1cd   : > { %2403 = vst [vmem:[%s3229_s23 + $0x60] sm:$0xff] %v2295_v60   ;;  %v1513_v38 = vmul.f32 0.2, %v1385_v62  ;;  %v1315_v45 = vmul.f32 %v3387_v47, %v3203_v40  ;;  %v1281_v36 = vmul.f32 %v3203_v40, %v3390_v31  ;;  %vm1449_vm9 = vcmp.ge.f32.partialorder %v1385_v62, 0.0 }
 0x1ce   : > { %2419 = vst [vmem:[%s3229_s23 + $0xe0] sm:$0xff] %v2375_v63   ;;  %v1383_v9 = vadd.f32 %v3205_v42, %v1312_v3  ;;  %v1354_v39 = vadd.f32 %v3205_v42, %v1283_v8  ;;  %v1545_v10 = vsel %vm1417_vm8, %v1353_v57, %v1481_v34  ;;  %v1479_v11 = vmul.f32 0.2, %v1351_v37 }
 0x1cf   : > { %v1386_v14 = vadd.f32 %v3205_v42, %v1315_v45  ;;  %v1352_v0 = vadd.f32 %v3205_v42, %v1281_v36  ;;  %vm1415_vm10 = vcmp.ge.f32.partialorder %v1351_v37, 0.0  ;;  %v1313_v47 = vmul.f32 %v3203_v40, %v3392_v50 }
 0x1d0   : > { %vm1418_vm11 = vcmp.ge.f32.partialorder %v1354_v39, 0.0  ;;  %v1482_v46 = vmul.f32 0.2, %v1354_v39  ;;  %v1577_v31 = vsel %vm1449_vm9, %v1385_v62, %v1513_v38  ;;  %v1511_v58 = vmul.f32 0.2, %v1383_v9 }
 0x1d1   : > { %vm1450_vm12 = vcmp.ge.f32.partialorder %v1386_v14, 0.0  ;;  %v1514_v15 = vmul.f32 0.2, %v1386_v14  ;;  %vm1416_vm13 = vcmp.ge.f32.partialorder %v1352_v0, 0.0  ;;  %v1480_v18 = vmul.f32 0.2, %v1352_v0 }
 0x1d2   : > { %v1546_v17 = vsel %vm1418_vm11, %v1354_v39, %v1482_v46  ;;  %v1384_v4 = vadd.f32 %v3205_v42, %v1313_v47  ;;  %v1543_v59 = vsel %vm1415_vm10, %v1351_v37, %v1479_v11  ;;  %vm1447_vm14 = vcmp.ge.f32.partialorder %v1383_v9, 0.0 }
 0x1d3   : > { %v2310_v5 = vpack.c.bf16 %v1546_v17, %v1545_v10  ;;  %v1578_v19 = vsel %vm1450_vm12, %v1386_v14, %v1514_v15  ;;  %v1544_v50 = vsel %vm1416_vm13, %v1352_v0, %v1480_v18  ;;  %v1575_v23 = vsel %vm1447_vm14, %v1383_v9, %v1511_v58 }
 0x1d4   : > { %v2390_v40 = vpack.c.bf16 %v1578_v19, %v1577_v31  ;;  %vm1448_vm15 = vcmp.ge.f32.partialorder %v1384_v4, 0.0  ;;  %v1512_v20 = vmul.f32 0.2, %v1384_v4  ;;  %v2305_v22 = vpack.c.bf16 %v1544_v50, %v1543_v59 }
 0x1d5   : > { %2406 = vst [vmem:[%s3229_s23 + $0x78] sm:$0xff] %v2310_v5  }
 0x1d6   : > { %2422 = vst [vmem:[%s3229_s23 + $0xf8] sm:$0xff] %v2390_v40   ;;  %v1576_v24 = vsel %vm1448_vm15, %v1384_v4, %v1512_v20  ;;  %2405 = vst [vmem:[%s3229_s23 + $0x70] sm:$0xff] %v2305_v22  }
 0x1d7   : > { %v2385_v42 = vpack.c.bf16 %v1576_v24, %v1575_v23 }
 0x1d9   : > { %2421 = vst [vmem:[%s3229_s23 + $0xf0] sm:$0xff] %v2385_v42  }
 0x1da   : > { %2823 = shalt.err (!%p2820_p13)
}
 0x1db   : > { %s2824_s9 = scalar_lea.hbm %s3472_s24, 4096  ;;  %s2828_s21 = scalar_lea.hbm %s3528_s4, 524288 }
 0x1dc   : > { %p2825_p4 = scmp.ne.s32.totalorder %s3472_s24, %s2824_s9  ;;  %p2829_p11 = scmp.lt.u32.totalorder %s3472_s24, %s3528_s4 }
 0x1dd   : > { %p2830_p1 = scmp.lt.u32.totalorder %s2828_s21, %s2824_s9  ;;  %p2832_p12 = scmp.lt.u32.totalorder %s2824_s9, %s3472_s24 }
 0x1de   : > { %p2826_p2 = pnand %p2825_p4, %p3090_p0 }
 0x1df   : > { %p2831_p10 = por %p2830_p1, %p2829_p11 }
 0x1e0   : > { %p2827_p8 = pneg %p2826_p2 }
 0x1e1   : > { %p2833_p6 = por %p2832_p12, %p2831_p10 }
 0x1e3   : > { %p2834_p3 = pnand %p2833_p6, %p2827_p8 }
 0x1e5   : > { %2837 = shalt.err (!%p2834_p3)
}
 0x1e6   : > { %s2909_s23 = smov 64   ;;  %s2910_s25 = smov 4  }
 0x1e7   : > { %2573 = dma.vmem_to_hbm [thread:$0]  (%p3090_p0), %s3474_s27, 4096, %s3472_s24, %s1900_s18, %s2909_s23, %s2909_s23, %s2910_s25  }
 0x1e8 PF: > { %s3548_s5 = sld [smem:[#allocation16_spill]]  ;;  %p2600_p5 = scmp.ge.s32.totalorder %s2900_s20, 2 }
 0x1e9   : > { %s1929_s7 = sand.u32 1, %s2880_s15  }
 0x1ea   : > { %s1930_s6 = scalar_lea.sflag [#allocation5], %s1929_s7 }
 0x1ee   : > { %p3549_p7 = scmp.ne.s32.totalorder %s3548_s5, 0 }
 0x1f0   : > { %p2590_p9 = pnand %p2600_p5, %p3549_p7 }
 0x1f2   : > { %2875 = dma.done.wait (!%p2590_p9), %s1930_s6, 4096  }
 0x1f3   : > { %2877 = vsyncadd (!%p2590_p9), %s1930_s6, 4294963200  ;;  %s22_s20 = sadd.s32 1, %s2900_s20   ;;  %s3550_s15 = smov %s2884_s16 }
 0x1f4   : > { %p19_p13 = scmp.ge.s32.totalorder %s22_s20, 130   ;;  %s3551_s16 = smov %s2888_s17 }
 0x1f5   : > { %s3552_s17 = smov %s3102_s22  ;;  %s3553_s18 = smov %s2896_s19 }
 0x1f6   : > { %s3554_s19 = smov %s3556_s11  ;;  %21 = sbr.rel (!%p19_p13) target bundleno = 8 (0x8), region = 104 }
 0x1fd   :  { %1935 = vsyncpa [#allocation4], 1 }
 0x1fe   :  { %1937 = vsyncpa [#allocation4 + $0x1], 1 }
 0x1ff   :  { %1938 = vsyncpa [#allocation7], 1 }
 0x200   :  { %1939 = vsyncpa [#allocation10], 1 }
 0x201   :  { %1940 = vsyncpa [#allocation5], 1 }
 0x202   :  { %1942 = vsyncpa [#allocation5 + $0x1], 1 }

</bundles_post_ra>
